<compile_context>
chip_gen: v7x
topology: tpu7x:2x2x1
jax: 0.10.0
libtpu: 0.0.40
codegen_flags: <defaults>
</compile_context>

<pallas_src>
import jax
import jax.numpy as jnp
from jax import lax
from jax.experimental import pallas as pl
from jax.experimental.pallas import tpu as pltpu

EPS = 1e-5


def _fold_bn(w, gamma, beta, mean, var, eps=EPS):
    """Fold frozen inference-mode BN into a conv weight whose LAST axis is Cout.

    Returns (w_folded, shift) such that conv(x, w_folded) + shift == bn(conv(x, w)).
    """
    scale = gamma / jnp.sqrt(var + eps)
    shift = beta - mean * scale
    return (w * scale).astype(jnp.float32), shift.astype(jnp.float32)


def _pick_tile_h(H, dil, max_tile_h=8):
    """Largest divisor of H that is <= max_tile_h and >= dilation."""
    for th in range(min(max_tile_h, H), 0, -1):
        if H % th == 0 and th >= dil:
            return th
    return H


# ---------------- fused Bottleneck kernel ------------------------------------

def _make_kernel(TH, W, H, planes, Cin, Cout, dil, HT, cdt):
    def kernel(x_ref, w1_ref, b1_ref, w2_ref, b2_ref, w3_ref, b3_ref,
               o_ref, t1p_ref, pat_ref, xres_ref):
        # x_ref:   (1, TH, W, Cin) f32 block (row-tile min(t, HT-1) of image n)
        # t1p_ref: (H+2*dil, W+2*dil, planes) compute_dtype -- persistent padded
        #          conv1+bn1+relu activation for the current image.
        # pat_ref: (TH*W, 9*planes) compute_dtype -- im2col slab for conv2.
        # xres_ref:(TH, W, Cin) f32 -- previous step's x tile (identity residual).
        t = pl.program_id(1)

        # ---- zero only the halo border strips, once per image -------------
        @pl.when(t == 0)
        def _zero_halo():
            zrow = jnp.zeros((dil, W + 2 * dil, planes), t1p_ref.dtype)
            t1p_ref[0:dil, :, :] = zrow
            t1p_ref[H + dil:H + 2 * dil, :, :] = zrow
            zcol = jnp.zeros((H + 2 * dil, dil, planes), t1p_ref.dtype)
            t1p_ref[:, 0:dil, :] = zcol
            t1p_ref[:, W + dil:W + 2 * dil, :] = zcol

        # ---- stage A: conv1 (1x1) + bn1 + relu for row-tile t --------------
        # (skipped on the final "drain" step t == HT)
        @pl.when(t < HT)
        def _conv1():
            x2d = x_ref[...].reshape(TH * W, Cin)
            t1 = jnp.dot(x2d.astype(cdt), w1_ref[...],
                         preferred_element_type=jnp.float32)
            t1 = jnp.maximum(t1 + b1_ref[...], 0.0)
            t1p_ref[pl.ds(dil + t * TH, TH), dil:dil + W, :] = (
                t1.reshape(TH, W, planes).astype(t1p_ref.dtype))

        # ---- stage B: conv2 (3x3 dilated, im2col) + bn2 + relu,
        #               conv3 (1x1) + bn3 + identity residual + relu
        #               for row-tile t-1 (skipped on the prologue step t == 0)
        @pl.when(t >= 1)
        def _conv23():
            r0 = (t - 1) * TH
            # Build the (TH*W, 9*planes) im2col slab once, then ONE deep-K dot.
            for ky in range(3):
                for kx in range(3):
                    i = ky * 3 + kx
                    p = t1p_ref[pl.ds(r0 + ky * dil, TH),
                                kx * dil:kx * dil + W, :]
                    pat_ref[:, i * planes:(i + 1) * planes] = (
                        p.reshape(TH * W, planes))
            t2 = jnp.dot(pat_ref[...], w2_ref[...],
                         preferred_element_type=jnp.float32)
            t2 = jnp.maximum(t2 + b2_ref[...], 0.0)

            t3 = jnp.dot(t2.astype(cdt), w3_ref[...],
                         preferred_element_type=jnp.float32)
            res = xres_ref[...].reshape(TH * W, Cout)   # f32 identity residual
            t3 = jnp.maximum(t3 + b3_ref[...] + res, 0.0)
            o_ref[...] = t3.reshape(1, TH, W, Cout).astype(o_ref.dtype)

        # ---- carry this step's x tile for next step's residual add --------
        @pl.when(t < HT)
        def _carry_residual():
            xres_ref[...] = x_ref[0]

    return kernel


def bottleneck_forward(x_nchw, params, stride=1, dilation=1,
                       compute_dtype=jnp.bfloat16, out_dtype=jnp.float32,
                       tile_h=None):
    """Fused Pallas forward of the PyTorch Bottleneck (downsample=None)."""
    N, Cin, H, W = x_nchw.shape
    w1_oihw = params["conv1"]          # (planes, Cin, 1, 1)
    w2_oihw = params["conv2"]          # (planes, planes, 3, 3)
    w3_oihw = params["conv3"]          # (planes*4, planes, 1, 1)
    planes = w1_oihw.shape[0]
    Cout = w3_oihw.shape[0]
    # downsample=None => identity residual => stride must be 1, inplanes==planes*4
    assert stride == 1 and Cin == Cout == planes * 4, (
        "downsample=None requires stride==1 and inplanes == planes * 4")

    dil = int(dilation)
    assert dil >= 1
    TH = tile_h if tile_h is not None else _pick_tile_h(H, dil)
    assert H % TH == 0 and TH >= dil, "tile_h must divide H and be >= dilation"
    HT = H // TH

    # Fold frozen BN scale into the weights; in-kernel epilogue is just "+shift".
    w1 = jnp.transpose(w1_oihw[:, :, 0, 0], (1, 0))          # (Cin, planes)
    w2 = jnp.transpose(w2_oihw, (2, 3, 1, 0))                # (ky,kx,in,out) HWIO
    w3 = jnp.transpose(w3_oihw[:, :, 0, 0], (1, 0))          # (planes, Cout)
    w1, b1 = _fold_bn(w1, *params["bn1"])
    w2, b2 = _fold_bn(w2, *params["bn2"])
    w3, b3 = _fold_bn(w3, *params["bn3"])

    cdt = compute_dtype
    w1 = w1.astype(cdt)
    w2 = w2.reshape(9 * planes, planes).astype(cdt)          # im2col weight, K=9*planes
    w3 = w3.astype(cdt)
    b1 = b1.reshape(1, planes)
    b2 = b2.reshape(1, planes)
    b3 = b3.reshape(1, Cout)

    # x stays f32 at the boundary: the identity residual is added in f32 (module
    # semantics); matmul operands are cast to compute_dtype inside the kernel.
    x_nhwc = jnp.transpose(x_nchw, (0, 2, 3, 1)).astype(jnp.float32)

    kernel = _make_kernel(TH, W, H, planes, Cin, Cout, dil, HT, cdt)

    # VMEM footprint estimate -> vmem_limit_bytes (clamped so it is v7x-safe).
    cs = jnp.dtype(cdt).itemsize
    vmem_est = (
        2 * TH * W * Cin * 4 +                                     # x blocks (2x)
        2 * TH * W * Cout * jnp.dtype(out_dtype).itemsize +        # out blocks (2x)
        (Cin * planes + 9 * planes * planes + planes * Cout) * cs  # weights (1x)
        + (2 * planes + Cout) * 4 +                                # bn shifts
        (H + 2 * dil) * (W + 2 * dil) * planes * cs +              # t1p scratch
        TH * W * 9 * planes * cs +                                 # im2col slab
        TH * W * Cin * 4)                                          # residual carry
    vmem_limit = int(min(max(2 * vmem_est, 32 << 20), 64 << 20))

    def _const_spec(shape):
        # Constant index_map -> single-buffer (double-buffering would be waste).
        return pl.BlockSpec(shape, lambda n, t: (0,) * len(shape),
                            pipeline_mode=pl.Buffered(1))

    out_nhwc = pl.pallas_call(
        kernel,
        out_shape=jax.ShapeDtypeStruct((N, H, W, Cout), out_dtype),
        grid=(N, HT + 1),
        in_specs=[
            # conv1 consumes row-tile t; the last step re-uses the previous block.
            pl.BlockSpec((1, TH, W, Cin),
                         lambda n, t: (n, jnp.minimum(t, HT - 1), 0, 0)),
            _const_spec((Cin, planes)),        # w1 (BN-folded)
            _const_spec((1, planes)),          # bn1 shift
            _const_spec((9 * planes, planes)), # w2 (BN-folded, im2col layout)
            _const_spec((1, planes)),          # bn2 shift
            _const_spec((planes, Cout)),       # w3 (BN-folded)
            _const_spec((1, Cout)),            # bn3 shift
        ],
        # Output lags conv1 by one step (written at steps 1..HT).
        out_specs=pl.BlockSpec((1, TH, W, Cout),
                               lambda n, t: (n, jnp.maximum(t - 1, 0), 0, 0)),
        scratch_shapes=[
            pltpu.VMEM((H + 2 * dil, W + 2 * dil, planes), cdt),  # padded conv1 act
            pltpu.VMEM((TH * W, 9 * planes), cdt),                # im2col slab
            pltpu.VMEM((TH, W, Cin), jnp.float32),                # residual carry
        ],
        compiler_params=pltpu.CompilerParams(
            dimension_semantics=("parallel", "arbitrary"),
            vmem_limit_bytes=vmem_limit,
        ),
    )(x_nhwc, w1, b1, w2, b2, w3, b3)

    return jnp.transpose(out_nhwc, (0, 3, 1, 2))  # back to NCHW


# ---------------- Pure-JAX reference (for correctness check) -----------------

def bottleneck_ref(x, params, stride=1, dilation=1, eps=EPS):
    def bn(z, p):
        g, b, m, v = p
        inv = 1.0 / jnp.sqrt(v + eps)
        return (z - m[None, :, None, None]) * (g * inv)[None, :, None, None] \
               + b[None, :, None, None]

    dn = ("NCHW", "OIHW", "NCHW")
    out = lax.conv_general_dilated(x, params["conv1"], (stride, stride),
                                   "VALID", dimension_numbers=dn)
    out = jax.nn.relu(bn(out, params["bn1"]))
    out = lax.conv_general_dilated(out, params["conv2"], (1, 1),
                                   [(dilation, dilation)] * 2,
                                   rhs_dilation=(dilation, dilation),
                                   dimension_numbers=dn)
    out = jax.nn.relu(bn(out, params["bn2"]))
    out = lax.conv_general_dilated(out, params["conv3"], (1, 1),
                                   "VALID", dimension_numbers=dn)
    out = bn(out, params["bn3"])
    out = out + x  # downsample is None
    return jax.nn.relu(out)


# ---------------- Main --------------------------------------------------------

if __name__ == "__main__":
    key = jax.random.PRNGKey(0)
    # Cin = Cout = 128 keeps the input/output lane dim 128-dense; still small.
    N, inplanes, planes, H, W = 2, 128, 32, 16, 16
    stride, dilation = 1, 2  # downsample=None => stride must be 1, inplanes=planes*4

    keys = jax.random.split(key, 8)

    def bn_params(k, c):
        k1, k2, k3, k4 = jax.random.split(k, 4)
        gamma = jax.random.uniform(k1, (c,), jnp.float32, 0.5, 1.5)
        beta = jax.random.normal(k2, (c,), jnp.float32) * 0.1
        mean = jax.random.normal(k3, (c,), jnp.float32) * 0.1
        var = jax.random.uniform(k4, (c,), jnp.float32, 0.5, 1.5)
        return (gamma, beta, mean, var)

    params = {
        "conv1": jax.random.normal(keys[0], (planes, inplanes, 1, 1), jnp.float32) * 0.05,
        "bn1": bn_params(keys[1], planes),
        "conv2": jax.random.normal(keys[2], (planes, planes, 3, 3), jnp.float32) * 0.05,
        "bn2": bn_params(keys[3], planes),
        "conv3": jax.random.normal(keys[4], (planes * 4, planes, 1, 1), jnp.float32) * 0.05,
        "bn3": bn_params(keys[5], planes * 4),
    }

    x = jax.random.normal(keys[6], (N, inplanes, H, W), jnp.float32)

    ref = jax.block_until_ready(
        bottleneck_ref(x, params, stride=stride, dilation=dilation))

    # Exact f32 compute path (module semantics, tight tolerance).
    out_f32 = jax.block_until_ready(
        bottleneck_forward(x, params, stride=stride, dilation=dilation,
                           compute_dtype=jnp.float32))
    assert out_f32.shape == ref.shape == (N, planes * 4, H, W)
    err32 = float(jnp.max(jnp.abs(out_f32 - ref)))
    assert jnp.allclose(out_f32, ref, rtol=1e-4, atol=1e-4), \
        f"f32 max abs err = {err32}"

    # Default bf16 MXU path (f32 accumulation, f32 residual/epilogue).
    out_bf16 = jax.block_until_ready(
        bottleneck_forward(x, params, stride=stride, dilation=dilation))
    errbf = float(jnp.max(jnp.abs(out_bf16 - ref)))
    assert jnp.allclose(out_bf16, ref, rtol=5e-2, atol=5e-2), \
        f"bf16 max abs err = {errbf}"

    print("KERNEL_OK")
</pallas_src>

<mosaic_0001>
module attributes {stable_mosaic.version = 11 : i64} {
  func.func @kernel(%arg0: i32, %arg1: i32, %arg2: memref<1x8x16x128xf32, #tpu.memory_space<vmem>>, %arg3: memref<128x32xf32, #tpu.memory_space<vmem>>, %arg4: memref<1x32xf32, #tpu.memory_space<vmem>>, %arg5: memref<288x32xf32, #tpu.memory_space<vmem>>, %arg6: memref<1x32xf32, #tpu.memory_space<vmem>>, %arg7: memref<32x128xf32, #tpu.memory_space<vmem>>, %arg8: memref<1x128xf32, #tpu.memory_space<vmem>>, %arg9: memref<1x8x16x128xf32, #tpu.memory_space<vmem>>, %arg10: memref<20x20x32xf32, #tpu.memory_space<vmem>>, %arg11: memref<128x288xf32, #tpu.memory_space<vmem>>, %arg12: memref<8x16x128xf32, #tpu.memory_space<vmem>>) attributes {dimension_semantics = [#tpu.dimension_semantics<parallel>, #tpu.dimension_semantics<arbitrary>], iteration_bounds = array<i64: 2, 3>, scalar_prefetch = 0 : i64, scratch_operands = 3 : i64, tpu.core_type = #tpu.core_type<tc>, window_params = [{transform_indices = @transform_0, window_bounds = array<i64: 1, 8, 16, 128>}, {pipeline_mode = #tpu.pipeline_mode<synchronous>, transform_indices = @transform_1, window_bounds = array<i64: 128, 32>}, {pipeline_mode = #tpu.pipeline_mode<synchronous>, transform_indices = @transform_2, window_bounds = array<i64: 1, 32>}, {pipeline_mode = #tpu.pipeline_mode<synchronous>, transform_indices = @transform_3, window_bounds = array<i64: 288, 32>}, {pipeline_mode = #tpu.pipeline_mode<synchronous>, transform_indices = @transform_4, window_bounds = array<i64: 1, 32>}, {pipeline_mode = #tpu.pipeline_mode<synchronous>, transform_indices = @transform_5, window_bounds = array<i64: 32, 128>}, {pipeline_mode = #tpu.pipeline_mode<synchronous>, transform_indices = @transform_6, window_bounds = array<i64: 1, 128>}, {transform_indices = @transform_7, window_bounds = array<i64: 1, 8, 16, 128>}]} {
    %c0_i32 = arith.constant 0 : i32
    %0 = arith.cmpi eq, %arg1, %c0_i32 : i32
    %1 = arith.extui %0 : i1 to i32
    %c0_i32_0 = arith.constant 0 : i32
    %2 = arith.cmpi ne, %1, %c0_i32_0 : i32
    scf.if %2 {
      %cst = arith.constant 0.000000e+00 : f32
      %12 = vector.broadcast %cst : f32 to vector<2x20x32xf32>
      %c0 = arith.constant 0 : index
      %c0_5 = arith.constant 0 : index
      %c0_6 = arith.constant 0 : index
      %13 = vector.load %arg10[%c0, %c0_5, %c0_6] : memref<20x20x32xf32, #tpu.memory_space<vmem>>, vector<2x20x32xf32>
      tpu.vector_store %arg10[%c0, %c0_5, %c0_6], %12 {strides = array<i32>} : memref<20x20x32xf32, #tpu.memory_space<vmem>>, vector<2x20x32xf32>,
      %c18 = arith.constant 18 : index
      %c0_7 = arith.constant 0 : index
      %c0_8 = arith.constant 0 : index
      %14 = vector.load %arg10[%c18, %c0_7, %c0_8] : memref<20x20x32xf32, #tpu.memory_space<vmem>>, vector<2x20x32xf32>
      tpu.vector_store %arg10[%c18, %c0_7, %c0_8], %12 {strides = array<i32>} : memref<20x20x32xf32, #tpu.memory_space<vmem>>, vector<2x20x32xf32>,
      %cst_9 = arith.constant 0.000000e+00 : f32
      %15 = vector.broadcast %cst_9 : f32 to vector<20x2x32xf32>
      %c0_10 = arith.constant 0 : index
      %c0_11 = arith.constant 0 : index
      %c0_12 = arith.constant 0 : index
      %16 = vector.load %arg10[%c0_10, %c0_11, %c0_12] : memref<20x20x32xf32, #tpu.memory_space<vmem>>, vector<20x2x32xf32>
      tpu.vector_store %arg10[%c0_10, %c0_11, %c0_12], %15 {strides = array<i32>} : memref<20x20x32xf32, #tpu.memory_space<vmem>>, vector<20x2x32xf32>,
      %c0_13 = arith.constant 0 : index
      %c18_14 = arith.constant 18 : index
      %c0_15 = arith.constant 0 : index
      %17 = vector.load %arg10[%c0_13, %c18_14, %c0_15] : memref<20x20x32xf32, #tpu.memory_space<vmem>>, vector<20x2x32xf32>
      tpu.vector_store %arg10[%c0_13, %c18_14, %c0_15], %15 {strides = array<i32>} : memref<20x20x32xf32, #tpu.memory_space<vmem>>, vector<20x2x32xf32>,
    } else {
    }
    %c2_i32 = arith.constant 2 : i32
    %3 = arith.cmpi slt, %arg1, %c2_i32 : i32
    %4 = arith.extui %3 : i1 to i32
    %c0_i32_1 = arith.constant 0 : i32
    %5 = arith.cmpi ne, %4, %c0_i32_1 : i32
    scf.if %5 {
      %c0 = arith.constant 0 : index
      %c0_5 = arith.constant 0 : index
      %c0_6 = arith.constant 0 : index
      %c0_7 = arith.constant 0 : index
      %12 = vector.load %arg2[%c0, %c0_5, %c0_6, %c0_7] : memref<1x8x16x128xf32, #tpu.memory_space<vmem>>, vector<1x8x16x128xf32>
      %13 = vector.shape_cast %12 : vector<1x8x16x128xf32> to vector<128x128xf32>
      %c0_8 = arith.constant 0 : index
      %c0_9 = arith.constant 0 : index
      %14 = vector.load %arg3[%c0_8, %c0_9] : memref<128x32xf32, #tpu.memory_space<vmem>>, vector<128x32xf32>
      %cst = arith.constant dense<0.000000e+00> : vector<128x32xf32>
      %15 = tpu.matmul %13, %14, %cst {dimension_numbers = #tpu.dot_dimension_numbers<[1], [0], [0], [1], [0, 0, 1, 1], [], []>} : vector<128x128xf32>, vector<128x32xf32>, vector<128x32xf32> -> vector<128x32xf32>
      %c0_10 = arith.constant 0 : index
      %c0_11 = arith.constant 0 : index
      %16 = vector.load %arg4[%c0_10, %c0_11] : memref<1x32xf32, #tpu.memory_space<vmem>>, vector<1x32xf32>
      %17 = vector.broadcast %16 : vector<1x32xf32> to vector<128x32xf32>
      %18 = arith.addf %15, %17 : vector<128x32xf32>
      %cst_12 = arith.constant 0.000000e+00 : f32
      %19 = vector.broadcast %cst_12 : f32 to vector<128x32xf32>
      %20 = arith.maximumf %18, %19 : vector<128x32xf32>
      %21 = vector.shape_cast %20 : vector<128x32xf32> to vector<8x16x32xf32>
      %c8_i32 = arith.constant 8 : i32
      %22 = arith.muli %arg1, %c8_i32 : i32
      %c2_i32_13 = arith.constant 2 : i32
      %23 = arith.addi %c2_i32_13, %22 : i32
      %24 = arith.index_cast %23 : i32 to index
      %c2 = arith.constant 2 : index
      %c0_14 = arith.constant 0 : index
      %25 = vector.load %arg10[%24, %c2, %c0_14] : memref<20x20x32xf32, #tpu.memory_space<vmem>>, vector<8x16x32xf32>
      tpu.vector_store %arg10[%24, %c2, %c0_14], %21 {strides = array<i32>} : memref<20x20x32xf32, #tpu.memory_space<vmem>>, vector<8x16x32xf32>,
    } else {
    }
    %c1_i32 = arith.constant 1 : i32
    %6 = arith.cmpi sge, %arg1, %c1_i32 : i32
    %7 = arith.extui %6 : i1 to i32
    %c0_i32_2 = arith.constant 0 : i32
    %8 = arith.cmpi ne, %7, %c0_i32_2 : i32
    scf.if %8 {
      %c1_i32_5 = arith.constant 1 : i32
      %12 = arith.subi %arg1, %c1_i32_5 : i32
      %c8_i32 = arith.constant 8 : i32
      %13 = arith.muli %12, %c8_i32 : i32
      %c0_i32_6 = arith.constant 0 : i32
      %14 = arith.addi %13, %c0_i32_6 : i32
      %15 = arith.index_cast %14 : i32 to index
      %c0 = arith.constant 0 : index
      %c0_7 = arith.constant 0 : index
      %16 = vector.load %arg10[%15, %c0, %c0_7] : memref<20x20x32xf32, #tpu.memory_space<vmem>>, vector<8x16x32xf32>
      %17 = vector.shape_cast %16 : vector<8x16x32xf32> to vector<128x32xf32>
      %c0_8 = arith.constant 0 : index
      %c0_9 = arith.constant 0 : index
      %18 = vector.load %arg11[%c0_8, %c0_9] : memref<128x288xf32, #tpu.memory_space<vmem>>, vector<128x32xf32>
      tpu.vector_store %arg11[%c0_8, %c0_9], %17 {strides = array<i32>} : memref<128x288xf32, #tpu.memory_space<vmem>>, vector<128x32xf32>,
      %c0_i32_10 = arith.constant 0 : i32
      %19 = arith.addi %13, %c0_i32_10 : i32
      %20 = arith.index_cast %19 : i32 to index
      %c2 = arith.constant 2 : index
      %c0_11 = arith.constant 0 : index
      %21 = vector.load %arg10[%20, %c2, %c0_11] : memref<20x20x32xf32, #tpu.memory_space<vmem>>, vector<8x16x32xf32>
      %22 = vector.shape_cast %21 : vector<8x16x32xf32> to vector<128x32xf32>
      %c0_12 = arith.constant 0 : index
      %c32 = arith.constant 32 : index
      %23 = vector.load %arg11[%c0_12, %c32] : memref<128x288xf32, #tpu.memory_space<vmem>>, vector<128x32xf32>
      tpu.vector_store %arg11[%c0_12, %c32], %22 {strides = array<i32>} : memref<128x288xf32, #tpu.memory_space<vmem>>, vector<128x32xf32>,
      %c0_i32_13 = arith.constant 0 : i32
      %24 = arith.addi %13, %c0_i32_13 : i32
      %25 = arith.index_cast %24 : i32 to index
      %c4 = arith.constant 4 : index
      %c0_14 = arith.constant 0 : index
      %26 = vector.load %arg10[%25, %c4, %c0_14] : memref<20x20x32xf32, #tpu.memory_space<vmem>>, vector<8x16x32xf32>
      %27 = vector.shape_cast %26 : vector<8x16x32xf32> to vector<128x32xf32>
      %c0_15 = arith.constant 0 : index
      %c64 = arith.constant 64 : index
      %28 = vector.load %arg11[%c0_15, %c64] : memref<128x288xf32, #tpu.memory_space<vmem>>, vector<128x32xf32>
      tpu.vector_store %arg11[%c0_15, %c64], %27 {strides = array<i32>} : memref<128x288xf32, #tpu.memory_space<vmem>>, vector<128x32xf32>,
      %c2_i32_16 = arith.constant 2 : i32
      %29 = arith.addi %13, %c2_i32_16 : i32
      %30 = arith.index_cast %29 : i32 to index
      %c0_17 = arith.constant 0 : index
      %c0_18 = arith.constant 0 : index
      %31 = vector.load %arg10[%30, %c0_17, %c0_18] : memref<20x20x32xf32, #tpu.memory_space<vmem>>, vector<8x16x32xf32>
      %32 = vector.shape_cast %31 : vector<8x16x32xf32> to vector<128x32xf32>
      %c0_19 = arith.constant 0 : index
      %c96 = arith.constant 96 : index
      %33 = vector.load %arg11[%c0_19, %c96] : memref<128x288xf32, #tpu.memory_space<vmem>>, vector<128x32xf32>
      tpu.vector_store %arg11[%c0_19, %c96], %32 {strides = array<i32>} : memref<128x288xf32, #tpu.memory_space<vmem>>, vector<128x32xf32>,
      %c2_i32_20 = arith.constant 2 : i32
      %34 = arith.addi %13, %c2_i32_20 : i32
      %35 = arith.index_cast %34 : i32 to index
      %c2_21 = arith.constant 2 : index
      %c0_22 = arith.constant 0 : index
      %36 = vector.load %arg10[%35, %c2_21, %c0_22] : memref<20x20x32xf32, #tpu.memory_space<vmem>>, vector<8x16x32xf32>
      %37 = vector.shape_cast %36 : vector<8x16x32xf32> to vector<128x32xf32>
      %c0_23 = arith.constant 0 : index
      %c128 = arith.constant 128 : index
      %38 = vector.load %arg11[%c0_23, %c128] : memref<128x288xf32, #tpu.memory_space<vmem>>, vector<128x32xf32>
      tpu.vector_store %arg11[%c0_23, %c128], %37 {strides = array<i32>} : memref<128x288xf32, #tpu.memory_space<vmem>>, vector<128x32xf32>,
      %c2_i32_24 = arith.constant 2 : i32
      %39 = arith.addi %13, %c2_i32_24 : i32
      %40 = arith.index_cast %39 : i32 to index
      %c4_25 = arith.constant 4 : index
      %c0_26 = arith.constant 0 : index
      %41 = vector.load %arg10[%40, %c4_25, %c0_26] : memref<20x20x32xf32, #tpu.memory_space<vmem>>, vector<8x16x32xf32>
      %42 = vector.shape_cast %41 : vector<8x16x32xf32> to vector<128x32xf32>
      %c0_27 = arith.constant 0 : index
      %c160 = arith.constant 160 : index
      %43 = vector.load %arg11[%c0_27, %c160] : memref<128x288xf32, #tpu.memory_space<vmem>>, vector<128x32xf32>
      tpu.vector_store %arg11[%c0_27, %c160], %42 {strides = array<i32>} : memref<128x288xf32, #tpu.memory_space<vmem>>, vector<128x32xf32>,
      %c4_i32 = arith.constant 4 : i32
      %44 = arith.addi %13, %c4_i32 : i32
      %45 = arith.index_cast %44 : i32 to index
      %c0_28 = arith.constant 0 : index
      %c0_29 = arith.constant 0 : index
      %46 = vector.load %arg10[%45, %c0_28, %c0_29] : memref<20x20x32xf32, #tpu.memory_space<vmem>>, vector<8x16x32xf32>
      %47 = vector.shape_cast %46 : vector<8x16x32xf32> to vector<128x32xf32>
      %c0_30 = arith.constant 0 : index
      %c192 = arith.constant 192 : index
      %48 = vector.load %arg11[%c0_30, %c192] : memref<128x288xf32, #tpu.memory_space<vmem>>, vector<128x32xf32>
      tpu.vector_store %arg11[%c0_30, %c192], %47 {strides = array<i32>} : memref<128x288xf32, #tpu.memory_space<vmem>>, vector<128x32xf32>,
      %c4_i32_31 = arith.constant 4 : i32
      %49 = arith.addi %13, %c4_i32_31 : i32
      %50 = arith.index_cast %49 : i32 to index
      %c2_32 = arith.constant 2 : index
      %c0_33 = arith.constant 0 : index
      %51 = vector.load %arg10[%50, %c2_32, %c0_33] : memref<20x20x32xf32, #tpu.memory_space<vmem>>, vector<8x16x32xf32>
      %52 = vector.shape_cast %51 : vector<8x16x32xf32> to vector<128x32xf32>
      %c0_34 = arith.constant 0 : index
      %c224 = arith.constant 224 : index
      %53 = vector.load %arg11[%c0_34, %c224] : memref<128x288xf32, #tpu.memory_space<vmem>>, vector<128x32xf32>
      tpu.vector_store %arg11[%c0_34, %c224], %52 {strides = array<i32>} : memref<128x288xf32, #tpu.memory_space<vmem>>, vector<128x32xf32>,
      %c4_i32_35 = arith.constant 4 : i32
      %54 = arith.addi %13, %c4_i32_35 : i32
      %55 = arith.index_cast %54 : i32 to index
      %c4_36 = arith.constant 4 : index
      %c0_37 = arith.constant 0 : index
      %56 = vector.load %arg10[%55, %c4_36, %c0_37] : memref<20x20x32xf32, #tpu.memory_space<vmem>>, vector<8x16x32xf32>
      %57 = vector.shape_cast %56 : vector<8x16x32xf32> to vector<128x32xf32>
      %c0_38 = arith.constant 0 : index
      %c256 = arith.constant 256 : index
      %58 = vector.load %arg11[%c0_38, %c256] : memref<128x288xf32, #tpu.memory_space<vmem>>, vector<128x32xf32>
      tpu.vector_store %arg11[%c0_38, %c256], %57 {strides = array<i32>} : memref<128x288xf32, #tpu.memory_space<vmem>>, vector<128x32xf32>,
      %c0_39 = arith.constant 0 : index
      %c0_40 = arith.constant 0 : index
      %59 = vector.load %arg11[%c0_39, %c0_40] : memref<128x288xf32, #tpu.memory_space<vmem>>, vector<128x288xf32>
      %c0_41 = arith.constant 0 : index
      %c0_42 = arith.constant 0 : index
      %60 = vector.load %arg5[%c0_41, %c0_42] : memref<288x32xf32, #tpu.memory_space<vmem>>, vector<288x32xf32>
      %cst = arith.constant dense<0.000000e+00> : vector<128x32xf32>
      %61 = tpu.matmul %59, %60, %cst {dimension_numbers = #tpu.dot_dimension_numbers<[1], [0], [0], [1], [0, 0, 1, 1], [], []>} : vector<128x288xf32>, vector<288x32xf32>, vector<128x32xf32> -> vector<128x32xf32>
      %c0_43 = arith.constant 0 : index
      %c0_44 = arith.constant 0 : index
      %62 = vector.load %arg6[%c0_43, %c0_44] : memref<1x32xf32, #tpu.memory_space<vmem>>, vector<1x32xf32>
      %63 = vector.broadcast %62 : vector<1x32xf32> to vector<128x32xf32>
      %64 = arith.addf %61, %63 : vector<128x32xf32>
      %cst_45 = arith.constant 0.000000e+00 : f32
      %65 = vector.broadcast %cst_45 : f32 to vector<128x32xf32>
      %66 = arith.maximumf %64, %65 : vector<128x32xf32>
      %c0_46 = arith.constant 0 : index
      %c0_47 = arith.constant 0 : index
      %67 = vector.load %arg7[%c0_46, %c0_47] : memref<32x128xf32, #tpu.memory_space<vmem>>, vector<32x128xf32>
      %cst_48 = arith.constant dense<0.000000e+00> : vector<128x128xf32>
      %68 = tpu.matmul %66, %67, %cst_48 {dimension_numbers = #tpu.dot_dimension_numbers<[1], [0], [0], [1], [0, 0, 1, 1], [], []>} : vector<128x32xf32>, vector<32x128xf32>, vector<128x128xf32> -> vector<128x128xf32>
      %c0_49 = arith.constant 0 : index
      %c0_50 = arith.constant 0 : index
      %c0_51 = arith.constant 0 : index
      %69 = vector.load %arg12[%c0_49, %c0_50, %c0_51] : memref<8x16x128xf32, #tpu.memory_space<vmem>>, vector<8x16x128xf32>
      %70 = vector.shape_cast %69 : vector<8x16x128xf32> to vector<128x128xf32>
      %c0_52 = arith.constant 0 : index
      %c0_53 = arith.constant 0 : index
      %71 = vector.load %arg8[%c0_52, %c0_53] : memref<1x128xf32, #tpu.memory_space<vmem>>, vector<1x128xf32>
      %72 = vector.broadcast %71 : vector<1x128xf32> to vector<128x128xf32>
      %73 = arith.addf %68, %72 : vector<128x128xf32>
      %74 = arith.addf %73, %70 : vector<128x128xf32>
      %cst_54 = arith.constant 0.000000e+00 : f32
      %75 = vector.broadcast %cst_54 : f32 to vector<128x128xf32>
      %76 = arith.maximumf %74, %75 : vector<128x128xf32>
      %77 = vector.shape_cast %76 : vector<128x128xf32> to vector<1x8x16x128xf32>
      %c0_55 = arith.constant 0 : index
      %c0_56 = arith.constant 0 : index
      %c0_57 = arith.constant 0 : index
      %c0_58 = arith.constant 0 : index
      %78 = vector.load %arg9[%c0_55, %c0_56, %c0_57, %c0_58] : memref<1x8x16x128xf32, #tpu.memory_space<vmem>>, vector<1x8x16x128xf32>
      tpu.vector_store %arg9[%c0_55, %c0_56, %c0_57, %c0_58], %77 {strides = array<i32>} : memref<1x8x16x128xf32, #tpu.memory_space<vmem>>, vector<1x8x16x128xf32>,
    } else {
    }
    %c2_i32_3 = arith.constant 2 : i32
    %9 = arith.cmpi slt, %arg1, %c2_i32_3 : i32
    %10 = arith.extui %9 : i1 to i32
    %c0_i32_4 = arith.constant 0 : i32
    %11 = arith.cmpi ne, %10, %c0_i32_4 : i32
    scf.if %11 {
      %c0 = arith.constant 0 : index
      %c0_5 = arith.constant 0 : index
      %c0_6 = arith.constant 0 : index
      %c0_7 = arith.constant 0 : index
      %12 = vector.load %arg2[%c0, %c0_5, %c0_6, %c0_7] : memref<1x8x16x128xf32, #tpu.memory_space<vmem>>, vector<1x8x16x128xf32>
      %13 = vector.shape_cast %12 : vector<1x8x16x128xf32> to vector<8x16x128xf32>
      %c0_8 = arith.constant 0 : index
      %c0_9 = arith.constant 0 : index
      %c0_10 = arith.constant 0 : index
      %14 = vector.load %arg12[%c0_8, %c0_9, %c0_10] : memref<8x16x128xf32, #tpu.memory_space<vmem>>, vector<8x16x128xf32>
      tpu.vector_store %arg12[%c0_8, %c0_9, %c0_10], %13 {strides = array<i32>} : memref<8x16x128xf32, #tpu.memory_space<vmem>>, vector<8x16x128xf32>,
    } else {
    }
    return
  }
  func.func @transform_0(%arg0: i32, %arg1: i32) -> (i32, i32, i32, i32) {
    %c1_i32 = arith.constant 1 : i32
    %0 = arith.minsi %arg1, %c1_i32 : i32
    %c0_i32 = arith.constant 0 : i32
    %c0_i32_0 = arith.constant 0 : i32
    %c0_i32_1 = arith.constant 0 : i32
    return %arg0, %0, %c0_i32, %c0_i32_0 : i32, i32, i32, i32
  }
  func.func @transform_1(%arg0: i32, %arg1: i32) -> (i32, i32) {
    %c0_i32 = arith.constant 0 : i32
    %c0_i32_0 = arith.constant 0 : i32
    %c0_i32_1 = arith.constant 0 : i32
    return %c0_i32, %c0_i32_0 : i32, i32
  }
  func.func @transform_2(%arg0: i32, %arg1: i32) -> (i32, i32) {
    %c0_i32 = arith.constant 0 : i32
    %c0_i32_0 = arith.constant 0 : i32
    %c0_i32_1 = arith.constant 0 : i32
    return %c0_i32, %c0_i32_0 : i32, i32
  }
  func.func @transform_3(%arg0: i32, %arg1: i32) -> (i32, i32) {
    %c0_i32 = arith.constant 0 : i32
    %c0_i32_0 = arith.constant 0 : i32
    %c0_i32_1 = arith.constant 0 : i32
    return %c0_i32, %c0_i32_0 : i32, i32
  }
  func.func @transform_4(%arg0: i32, %arg1: i32) -> (i32, i32) {
    %c0_i32 = arith.constant 0 : i32
    %c0_i32_0 = arith.constant 0 : i32
    %c0_i32_1 = arith.constant 0 : i32
    return %c0_i32, %c0_i32_0 : i32, i32
  }
  func.func @transform_5(%arg0: i32, %arg1: i32) -> (i32, i32) {
    %c0_i32 = arith.constant 0 : i32
    %c0_i32_0 = arith.constant 0 : i32
    %c0_i32_1 = arith.constant 0 : i32
    return %c0_i32, %c0_i32_0 : i32, i32
  }
  func.func @transform_6(%arg0: i32, %arg1: i32) -> (i32, i32) {
    %c0_i32 = arith.constant 0 : i32
    %c0_i32_0 = arith.constant 0 : i32
    %c0_i32_1 = arith.constant 0 : i32
    return %c0_i32, %c0_i32_0 : i32, i32
  }
  func.func @transform_7(%arg0: i32, %arg1: i32) -> (i32, i32, i32, i32) {
    %c1_i32 = arith.constant 1 : i32
    %0 = arith.subi %arg1, %c1_i32 : i32
    %c0_i32 = arith.constant 0 : i32
    %1 = arith.maxsi %0, %c0_i32 : i32
    %c0_i32_0 = arith.constant 0 : i32
    %c0_i32_1 = arith.constant 0 : i32
    %c0_i32_2 = arith.constant 0 : i32
    return %arg0, %1, %c0_i32_0, %c0_i32_1 : i32, i32, i32, i32
  }
}

</mosaic_0001>

<bundles_post_ra>
// kernel: tpu_custom_call.1
= control target key start
LH: loop header
LB: loop body
LE: loop exit
PB: predicated region body
PF: predicated region fallthrough
CT: control target
= control target key end

     0   :  { %s4035_s0 = inlined_call_operand.vmem [shape: f32[2,16,16,128], index: 0, kind: input, shape index: {}]   ;;  %s4036_s1 = inlined_call_operand.vmem [shape: f32[128,32], index: 1, kind: input, shape index: {}]   ;;  %s4037_s2 = inlined_call_operand.vmem [shape: f32[1,32], index: 2, kind: input, shape index: {}]   ;;  %s4038_s3 = inlined_call_operand.vmem [shape: f32[288,32], index: 3, kind: input, shape index: {}]   ;;  %s4039_s4 = inlined_call_operand.vmem [shape: f32[1,32], index: 4, kind: input, shape index: {}]   ;;  %s4040_s5 = inlined_call_operand.vmem [shape: f32[32,128], index: 5, kind: input, shape index: {}]   ;;  %s4041_s6 = inlined_call_operand.vmem [shape: f32[1,128], index: 6, kind: input, shape index: {}]   ;;  %s4042_s7 = inlined_call_operand.hbm [shape: f32[2,16,16,128], index: 7, kind: output, shape index: {}]  }
   0x1   :  { %4049 = sst [smem:[#allocation11_spill]] %s4035_s0 }
   0x2   :  { %12 = vsyncpa [#allocation6], 0 }
   0x3   :  { %14 = vsyncpa [#allocation6 + $0x1], 0  ;;  %s2945_s24 = smov 0   ;;  %s2947_s25 = smov 0  }
   0x4   :  { %s2949_s26 = smov 0   ;;  %s2951_s27 = smov 0  }
   0x5   :  { %s2953_s28 = smov 0   ;;  %s2955_s29 = smov 0  }
   0x6   :  { %s2957_s30 = smov 0   ;;  %s2959_s8 = smov 0  }
   0x7 LB: > { %4050 = sst [smem:[#allocation8_spill]] %s2892_s30  ;;  %s2176_s9 = sadd.s32 4294967295, %s2896_s8   ;;  %s2896_s8 = sphi %s2959_s8, %s20_s8   ;;  %s2892_s30 = sphi %s2957_s30, %s4060_s30   ;;  %s2888_s29 = sphi %s2955_s29, %s4065_s29   ;;  %s2884_s28 = sphi %s2953_s28, %s4058_s28   ;;  %s2880_s27 = sphi %s2951_s27, %s4064_s27   ;;  %s2876_s26 = sphi %s2949_s26, %s4063_s26   ;;  %s2872_s25 = sphi %s2947_s25, %s4062_s25   ;;  %s2868_s24 = sphi %s2945_s24, %s4061_s24  }
   0x8   : > { %s2177_s10 = sadd.s32 4294967294, %s2896_s8   ;;  %s29_s11 = sadd.s32 1, %s2888_s29 }
   0x9   : > { %s32_s12 = sadd.s32 1, %s2892_s30  ;;  %p30_p0 = scmp.ge.s32.totalorder %s29_s11, 3 }
   0xa   : > { %s2178_s13 = sadd.s32 4294967295, %s2888_s29  ;;  %s205_s14 = sadd.s32 1, %s2876_s26 }
   0xb   : > { %p195_p1 = scmp.gt.s32.totalorder %s2178_s13, 0  ;;  %s4067_s11 = smov (%p30_p0, %s29_s11), 0 }
   0xc   : > { %4051 = sst [smem:[#allocation9_spill]] %s4067_s11  ;;  %s4069_s12 = smov (!%p30_p0, %s32_s12), %s2892_s30 }
   0xd   : > { %s4071_s13 = smov (!%p195_p1, %s2178_s13), 0  ;;  %p34_p2 = scmp.ge.s32.totalorder %s4069_s12, 2 }
   0xe   : > { %s2179_s15 = sadd.s32 4294967295, %s4067_s11  ;;  %p215_p4 = scmp.ne.s32.totalorder %s2876_s26, %s2872_s25 }
   0xf   : > { %p198_p3 = scmp.gt.s32.totalorder %s2179_s15, 0  ;;  %s4073_s12 = smov (%p34_p2, %s4069_s12), 0 }
  0x10   : > { %4052 = sst [smem:[#allocation10_spill]] %s4073_s12  ;;  %s200_s16 = ssub.s32 %s2892_s30, %s4073_s12 }
  0x11   : > { %s4075_s15 = smov (!%p198_p3, %s2179_s15), 0  ;;  %p216_p5 = scmp.eq.s32.totalorder %s2176_s9, 5 }
  0x12   : > { %s201_s17 = ssub.s32 %s4071_s13, %s4075_s15  ;;  %p221_p6 = scmp.ne.s32.totalorder %s2872_s25, %s2868_s24 }
  0x13   : > { %s202_s18 = sor.u32 %s201_s17, %s200_s16  ;;  %p3003_p7 = por %p216_p5, %p215_p4 }
  0x14   : > { %p203_p8 = scmp.eq.s32.totalorder %s202_s18, 0  ;;  %p222_p9 = scmp.eq.s32.totalorder %s2177_s10, 5 }
  0x15   : > { %p2182_p10 = scmp.ge.s32.totalorder %s2896_s8, 1  ;;  %p276_p11 = scmp.lt.s32.totalorder %s2896_s8, 7 }
  0x16   : > { %s3010_s20 = scalar_select %p203_p8, %s2876_s26, %s205_s14  }
  0x17   : > { %p3012_p12 = por %p222_p9, %p221_p6  ;;  %p277_p13 = pnand %p2182_p10, %p276_p11 }
  0x18   : > { %s4046_s22 = sand.u32 (!%p277_p13), 1, %s2872_s25   ;;  %p315_p0 = scmp.lt.s32.totalorder (!%p277_p13), %s2880_s27, 1 }
  0x19   : > { %280 = sbr.rel (%p277_p13) target bundleno = 1125 (0x465), region = 48  ;;  %s2183_s23 = sshll.u32 (!%p277_p13), %s4046_s22, 7 }
  0x1a   : > { %p318_p1 = scmp.lt.s32.totalorder (!%p277_p13), %s2884_s28, 1  ;;  %s4055_s0 = sld [smem:[#allocation11_spill]] (!%p277_p13) }
  0x1b   : > { %s3030_s30 = scalar_lea.vmem (!%p277_p13), [#allocation5], %s2183_s23  ;;  %p2188_p3 = scmp.ne.s32.totalorder (!%p277_p13), %s2880_s27, 0 }
  0x20   : > { %s316_s9 = scalar_select %p315_p0, %s2880_s27, 1 }
  0x21   : > { %s319_s10 = scalar_select %p318_p1, %s2884_s28, 1 }
  0x22   : > { %s2184_s13 = sshll.u32 %s316_s9, 3  ;;  %vm338_vm0 = vcmask (!%p2188_p3), 261120   ;;  %vm341_vm1 = vcmask (!%p2188_p3), 257024   ;;  %vm353_vm2 = vcmask (!%p2188_p3), 254976   ;;  %v2898_v0 = vmov (!%p2188_p3), 0.0  }
  0x23   : > { %p320_p2 = scmp.lt.s32.totalorder %s2184_s13, 15  ;;  %s2186_s14 = sshll.u32 %s319_s10, 5  ;;  %339 = vst.msk [vmem:[#allocation2] sm:$0xff] (!%p2188_p3), %vm338_vm0, %v2898_v0  ;;  %340 = vst.msk [vmem:[#allocation2 + $0x8] sm:$0xff] (!%p2188_p3), %vm338_vm0, %v2898_v0 }
  0x24   : > { %337 = sbr.rel (%p2188_p3) target bundleno = 61 (0x3d), region = 52  ;;  %343 = vst.msk [vmem:[#allocation2 + $0x18] sm:$0xff] (!%p2188_p3), %vm338_vm0, %v2898_v0  ;;  %344 = vst.msk [vmem:[#allocation2 + $0x20] sm:$0xff] (!%p2188_p3), %vm338_vm0, %v2898_v0 }
  0x25   : > { %s4077_s13 = smov (!%p320_p2, %s2184_s13), 15  ;;  %347 = vst.msk [vmem:[#allocation2 + $0x1b0] sm:$0xff] (!%p2188_p3), %vm338_vm0, %v2898_v0  ;;  %348 = vst.msk [vmem:[#allocation2 + $0x1b8] sm:$0xff] (!%p2188_p3), %vm338_vm0, %v2898_v0 }
  0x26   : > { %s2185_s15 = sshll.u32 %s4077_s13, 1  ;;  %350 = vst.msk [vmem:[#allocation2 + $0x1c8] sm:$0xff] (!%p2188_p3), %vm338_vm0, %v2898_v0  ;;  %351 = vst.msk [vmem:[#allocation2 + $0x1d0] sm:$0xff] (!%p2188_p3), %vm338_vm0, %v2898_v0 }
  0x27   : > { %s324_s16 = sadd.s32 %s2186_s14, %s2185_s15  ;;  %342 = vst.msk [vmem:[#allocation2 + $0x10] sm:$0xf] (!%p2188_p3), %vm341_vm1, %v2898_v0  ;;  %345 = vst.msk [vmem:[#allocation2 + $0x28] sm:$0xf] (!%p2188_p3), %vm341_vm1, %v2898_v0 }
  0x28   : > { %s2187_s17 = sshll.u32 %s324_s16, 3  ;;  %349 = vst.msk [vmem:[#allocation2 + $0x1c0] sm:$0xf] (!%p2188_p3), %vm341_vm1, %v2898_v0  ;;  %352 = vst.msk [vmem:[#allocation2 + $0x1d8] sm:$0xf] (!%p2188_p3), %vm341_vm1, %v2898_v0 }
  0x29   : > { %s3028_s11 = scalar_lea.vmem %s4055_s0, %s2187_s17  ;;  %356 = vst.msk [vmem:[#allocation2 + $0x30] sm:$0x3] (!%p2188_p3), %vm353_vm2, %v2898_v0  ;;  %357 = vst.msk [vmem:[#allocation2 + $0x48] sm:$0x3] (!%p2188_p3), %vm353_vm2, %v2898_v0 }
  0x2a   : > { %358 = vst.msk [vmem:[#allocation2 + $0x60] sm:$0x3] (!%p2188_p3), %vm353_vm2, %v2898_v0  ;;  %359 = vst.msk [vmem:[#allocation2 + $0x78] sm:$0x3] (!%p2188_p3), %vm353_vm2, %v2898_v0 }
  0x2b   : > { %360 = vst.msk [vmem:[#allocation2 + $0x90] sm:$0x3] %vm353_vm2, %v2898_v0  ;;  %361 = vst.msk [vmem:[#allocation2 + $0xa8] sm:$0x3] %vm353_vm2, %v2898_v0 }
  0x2c   : > { %362 = vst.msk [vmem:[#allocation2 + $0xc0] sm:$0x3] %vm353_vm2, %v2898_v0  ;;  %363 = vst.msk [vmem:[#allocation2 + $0xd8] sm:$0x3] %vm353_vm2, %v2898_v0 }
  0x2d   : > { %364 = vst.msk [vmem:[#allocation2 + $0xf0] sm:$0x3] %vm353_vm2, %v2898_v0  ;;  %365 = vst.msk [vmem:[#allocation2 + $0x108] sm:$0x3] %vm353_vm2, %v2898_v0 }
  0x2e   : > { %366 = vst.msk [vmem:[#allocation2 + $0x120] sm:$0x3] %vm353_vm2, %v2898_v0  ;;  %367 = vst.msk [vmem:[#allocation2 + $0x138] sm:$0x3] %vm353_vm2, %v2898_v0 }
  0x2f   : > { %368 = vst.msk [vmem:[#allocation2 + $0x150] sm:$0x3] %vm353_vm2, %v2898_v0  ;;  %369 = vst.msk [vmem:[#allocation2 + $0x168] sm:$0x3] %vm353_vm2, %v2898_v0 }
  0x30   : > { %370 = vst.msk [vmem:[#allocation2 + $0x180] sm:$0x3] %vm353_vm2, %v2898_v0  ;;  %371 = vst.msk [vmem:[#allocation2 + $0x198] sm:$0x3] %vm353_vm2, %v2898_v0 }
  0x31   : > { %376 = vst.msk [vmem:[#allocation2 + $0x42] sm:$0x3] %vm353_vm2, %v2898_v0  ;;  %377 = vst.msk [vmem:[#allocation2 + $0x5a] sm:$0x3] %vm353_vm2, %v2898_v0 }
  0x32   : > { %378 = vst.msk [vmem:[#allocation2 + $0x72] sm:$0x3] %vm353_vm2, %v2898_v0  ;;  %379 = vst.msk [vmem:[#allocation2 + $0x8a] sm:$0x3] %vm353_vm2, %v2898_v0 }
  0x33   : > { %380 = vst.msk [vmem:[#allocation2 + $0xa2] sm:$0x3] %vm353_vm2, %v2898_v0  ;;  %381 = vst.msk [vmem:[#allocation2 + $0xba] sm:$0x3] %vm353_vm2, %v2898_v0 }
  0x34   : > { %382 = vst.msk [vmem:[#allocation2 + $0xd2] sm:$0x3] %vm353_vm2, %v2898_v0  ;;  %383 = vst.msk [vmem:[#allocation2 + $0xea] sm:$0x3] %vm353_vm2, %v2898_v0 }
  0x35   : > { %384 = vst.msk [vmem:[#allocation2 + $0x102] sm:$0x3] %vm353_vm2, %v2898_v0  ;;  %385 = vst.msk [vmem:[#allocation2 + $0x11a] sm:$0x3] %vm353_vm2, %v2898_v0 }
  0x36   : > { %386 = vst.msk [vmem:[#allocation2 + $0x132] sm:$0x3] %vm353_vm2, %v2898_v0  ;;  %387 = vst.msk [vmem:[#allocation2 + $0x14a] sm:$0x3] %vm353_vm2, %v2898_v0 }
  0x37   : > { %388 = vst.msk [vmem:[#allocation2 + $0x162] sm:$0x3] %vm353_vm2, %v2898_v0  ;;  %389 = vst.msk [vmem:[#allocation2 + $0x17a] sm:$0x3] %vm353_vm2, %v2898_v0 }
  0x38   : > { %390 = vst.msk [vmem:[#allocation2 + $0x192] sm:$0x3] %vm353_vm2, %v2898_v0  ;;  %391 = vst.msk [vmem:[#allocation2 + $0x1aa] sm:$0x3] %vm353_vm2, %v2898_v0 }
  0x39   : > { %354 = vst.msk [vmem:[#allocation2] sm:$0x3] %vm353_vm2, %v2898_v0  ;;  %355 = vst.msk [vmem:[#allocation2 + $0x18] sm:$0x3] %vm353_vm2, %v2898_v0 }
  0x3a   : > { %372 = vst.msk [vmem:[#allocation2 + $0x1b0] sm:$0x3] %vm353_vm2, %v2898_v0  ;;  %373 = vst.msk [vmem:[#allocation2 + $0x1c8] sm:$0x3] %vm353_vm2, %v2898_v0 }
  0x3b   : > { %374 = vst.msk [vmem:[#allocation2 + $0x12] sm:$0x3] %vm353_vm2, %v2898_v0  ;;  %375 = vst.msk [vmem:[#allocation2 + $0x2a] sm:$0x3] %vm353_vm2, %v2898_v0 }
  0x3c   : > { %392 = vst.msk [vmem:[#allocation2 + $0x1c2] sm:$0x3] %vm353_vm2, %v2898_v0  ;;  %393 = vst.msk [vmem:[#allocation2 + $0x1da] sm:$0x3] %vm353_vm2, %v2898_v0 }
  0x3d PF: > { %p2189_p4 = scmp.ge.s32.totalorder %s2880_s27, 2 }
  0x3e   : > { %v414_v1 = vld [vmem:[%s4036_s1] sm:$0xff] (!%p2189_p4)  ;;  %v415_v2 = vld [vmem:[%s4036_s1 + $0x8] sm:$0xff] (!%p2189_p4)  ;;  %v416_v3 = vld [vmem:[%s4036_s1 + $0x10] sm:$0xff] (!%p2189_p4)  ;;  %s2192_s13 = smul.u32 (!%p2189_p4), 192, %s2880_s27  ;;  %vm602_vm3 = vcmask (!%p2189_p4), 261120  }
  0x3f   : > { %397 = sbr.rel (%p2189_p4) target bundleno = 327 (0x147), region = 56  ;;  %v2629_v4 = vpack.c.bf16 (!%p2189_p4), %v415_v2, %v414_v1  ;;  %v417_v5 = vld [vmem:[%s4036_s1 + $0x18] sm:$0xff] (!%p2189_p4)  ;;  %v418_v7 = vld [vmem:[%s4036_s1 + $0x20] sm:$0xff] (!%p2189_p4)  ;;  %v419_v8 = vld [vmem:[%s4036_s1 + $0x28] sm:$0xff] (!%p2189_p4) }
  0x40   : > { %v2633_v6 = vpack.c.bf16 (!%p2189_p4), %v417_v5, %v416_v3  ;;  %v2637_v9 = vpack.c.bf16 (!%p2189_p4), %v419_v8, %v418_v7  ;;  %v398_v10 = vld [vmem:[%s3028_s11] sm:$0xff] (!%p2189_p4)  ;;  %v420_v12 = vld [vmem:[%s4036_s1 + $0x30] sm:$0xff] (!%p2189_p4)  ;;  %v421_v13 = vld [vmem:[%s4036_s1 + $0x38] sm:$0xff] (!%p2189_p4)  ;;  %s3144_s14 = scalar_lea.vmem (!%p2189_p4), [#allocation2], %s2192_s13 }
  0x41   : > { %2630 = vmatprep.subr.bf16.mxu0 (!%p2189_p4), %v2629_v4  ;;  %2709 = vmatprep.subr.bf16.mxu1 (!%p2189_p4), %v2629_v4  ;;  %v406_v11 = vld [vmem:[%s3028_s11 + $0x40] sm:$0xff] (!%p2189_p4)  ;;  %v2641_v14 = vpack.c.bf16 (!%p2189_p4), %v421_v13, %v420_v12  ;;  %v423_v16 = vld [vmem:[%s4036_s1 + $0x48] sm:$0xff] (!%p2189_p4)  ;;  %v424_v18 = vld [vmem:[%s4036_s1 + $0x50] sm:$0xff] (!%p2189_p4) }
  0x42   : > { %2632 = vmatpush3.bf16.msra.mxu0 (!%p2189_p4), %v2629_v4  ;;  %2717 = vmatpush3.bf16.msra.mxu1 (!%p2189_p4), %v2629_v4  ;;  %v422_v15 = vld [vmem:[%s4036_s1 + $0x40] sm:$0xff] (!%p2189_p4)  ;;  %v425_v19 = vld [vmem:[%s4036_s1 + $0x58] sm:$0xff] (!%p2189_p4)  ;;  %v427_v22 = vld [vmem:[%s4036_s1 + $0x68] sm:$0xff] (!%p2189_p4) }
  0x43   : > { %2634 = vmatprep.subr.bf16.mxu0 (!%p2189_p4), %v2633_v6  ;;  %2710 = vmatprep.subr.bf16.mxu1 (!%p2189_p4), %v2633_v6  ;;  %v2645_v17 = vpack.c.bf16 (!%p2189_p4), %v423_v16, %v422_v15  ;;  %v2649_v20 = vpack.c.bf16 (!%p2189_p4), %v425_v19, %v424_v18  ;;  %v426_v21 = vld [vmem:[%s4036_s1 + $0x60] sm:$0xff] (!%p2189_p4)  ;;  %v428_v24 = vld [vmem:[%s4036_s1 + $0x70] sm:$0xff] (!%p2189_p4)  ;;  %v429_v25 = vld [vmem:[%s4036_s1 + $0x78] sm:$0xff] (!%p2189_p4) }
  0x44   : > { %2541 = vmatprep.mubr.f32.mxu0 (!%p2189_p4), %v398_v10  ;;  %2553 = vmatprep.mubr.f32.mxu1 (!%p2189_p4), %v406_v11  ;;  %v2653_v23 = vpack.c.bf16 (!%p2189_p4), %v427_v22, %v426_v21  ;;  %v2657_v26 = vpack.c.bf16 (!%p2189_p4), %v429_v25, %v428_v24  ;;  %v399_v27 = vld [vmem:[%s3028_s11 + $0x8] sm:$0xff] (!%p2189_p4)  ;;  %v400_v29 = vld [vmem:[%s3028_s11 + $0x10] sm:$0xff] (!%p2189_p4)  ;;  %v401_v31 = vld [vmem:[%s3028_s11 + $0x18] sm:$0xff] (!%p2189_p4) }
  0x45   : > { %v407_v28 = vld [vmem:[%s3028_s11 + $0x48] sm:$0xff] (!%p2189_p4)  ;;  %v408_v30 = vld [vmem:[%s3028_s11 + $0x50] sm:$0xff] (!%p2189_p4)  ;;  %v409_v32 = vld [vmem:[%s3028_s11 + $0x58] sm:$0xff] (!%p2189_p4) }
  0x46   : > { %2636 = vmatpush3.bf16.msra.mxu0 %v2633_v6  ;;  %2718 = vmatpush3.bf16.msra.mxu1 %v2633_v6  ;;  %v402_v33 = vld [vmem:[%s3028_s11 + $0x20] sm:$0xff]  ;;  %v403_v35 = vld [vmem:[%s3028_s11 + $0x28] sm:$0xff]  ;;  %v404_v37 = vld [vmem:[%s3028_s11 + $0x30] sm:$0xff] }
  0x47   : > { %2638 = vmatprep.subr.bf16.mxu0 %v2637_v9  ;;  %2711 = vmatprep.subr.bf16.mxu1 %v2637_v9  ;;  %v410_v34 = vld [vmem:[%s3028_s11 + $0x60] sm:$0xff]  ;;  %v411_v36 = vld [vmem:[%s3028_s11 + $0x68] sm:$0xff]  ;;  %v412_v38 = vld [vmem:[%s3028_s11 + $0x70] sm:$0xff] }
  0x48   : > { %v405_v39 = vld [vmem:[%s3028_s11 + $0x38] sm:$0xff]  ;;  %v2190_v41 = vld [vmem:[%s4037_s2] ss:$0 sm:$0xff] }
  0x49   : > { %v413_v40 = vld [vmem:[%s3028_s11 + $0x78] sm:$0xff] }
  0x4a   : > { %2640 = vmatpush3.bf16.msra.mxu0 %v2637_v9  ;;  %2719 = vmatpush3.bf16.msra.mxu1 %v2637_v9 }
  0x4b   : > { %2642 = vmatprep.subr.bf16.mxu0 %v2641_v14  ;;  %2712 = vmatprep.subr.bf16.mxu1 %v2641_v14 }
  0x4e   : > { %2644 = vmatpush3.bf16.msra.mxu0 %v2641_v14  ;;  %2720 = vmatpush3.bf16.msra.mxu1 %v2641_v14 }
  0x4f   : > { %2646 = vmatprep.subr.bf16.mxu0 %v2645_v17  ;;  %2713 = vmatprep.subr.bf16.mxu1 %v2645_v17 }
  0x52   : > { %2648 = vmatpush3.bf16.msra.mxu0 %v2645_v17  ;;  %2721 = vmatpush3.bf16.msra.mxu1 %v2645_v17 }
  0x53   : > { %2650 = vmatprep.subr.bf16.mxu0 %v2649_v20  ;;  %2714 = vmatprep.subr.bf16.mxu1 %v2649_v20 }
  0x56   : > { %2652 = vmatpush3.bf16.msra.mxu0 %v2649_v20  ;;  %2722 = vmatpush3.bf16.msra.mxu1 %v2649_v20 }
  0x57   : > { %2654 = vmatprep.subr.bf16.mxu0 %v2653_v23  ;;  %2715 = vmatprep.subr.bf16.mxu1 %v2653_v23 }
  0x5a   : > { %2656 = vmatpush3.bf16.msra.mxu0 %v2653_v23  ;;  %2723 = vmatpush3.bf16.msra.mxu1 %v2653_v23 }
  0x5b   : > { %2658 = vmatprep.subr.bf16.mxu0 %v2657_v26  ;;  %2716 = vmatprep.subr.bf16.mxu1 %v2657_v26 }
  0x5e   : > { %2660 = vmatpush3.bf16.msra.mxu0 %v2657_v26  ;;  %2724 = vmatpush3.bf16.msra.mxu1 %v2657_v26 }
  0x61   : > { %2542 = vmatmul.mubr.f32.vlgmr.msra.gmra.mrb[0].mxu0 %v399_v27  ;;  %2554 = vmatmul.mubr.f32.vlgmr.msra.gmra.mrb[0].mxu1 %v407_v28 }
  0x62   : > { %2544 = vmatprep.mubr.f32.mxu0 %v400_v29  ;;  %2556 = vmatprep.mubr.f32.mxu1 %v408_v30 }
  0x65   : > { %2545 = vmatmul.mubr.f32.gmra.mrb[2].mxu0 %v401_v31  ;;  %2557 = vmatmul.mubr.f32.gmra.mrb[2].mxu1 %v409_v32 }
  0x66   : > { %2547 = vmatprep.mubr.f32.mxu0 %v402_v33  ;;  %2559 = vmatprep.mubr.f32.mxu1 %v410_v34 }
  0x69   : > { %2548 = vmatmul.mubr.f32.gmra.mrb[4].mxu0 %v403_v35  ;;  %2560 = vmatmul.mubr.f32.gmra.mrb[4].mxu1 %v411_v36 }
  0x6a   : > { %2550 = vmatprep.mubr.f32.mxu0 %v404_v37  ;;  %2562 = vmatprep.mubr.f32.mxu1 %v412_v38 }
  0x6d   : > { %2551 = vmatmul.mubr.f32.gmra.mrb[6].mxu0 %v405_v39  ;;  %2563 = vmatmul.mubr.f32.gmra.mrb[6].mxu1 %v413_v40 }
 0x134   : > { %v2543_v42 = vpop.f32.mrb[0].mxu0  ;;  %v2555_v43 = vpop.f32.mrb[0].mxu1 }
 0x135   : > { %v509_v44 = vadd.f32 %v2543_v42, %v2190_v41  ;;  %v549_v45 = vadd.f32 %v2555_v43, %v2190_v41  ;;  %v503_v46 = vpop.f32.mrb[1].mxu0  ;;  %v543_v47 = vpop.f32.mrb[1].mxu1 }
 0x136   : > { %v504_v48 = vadd.f32 %v2190_v41, %v503_v46  ;;  %v544_v49 = vadd.f32 %v2190_v41, %v543_v47 }
 0x137   : > { %v583_v50 = vmax.f32 %v509_v44, 0.0  ;;  %v591_v51 = vmax.f32 %v549_v45, 0.0 }
 0x138   : > { %v582_v52 = vmax.f32 %v504_v48, 0.0  ;;  %v590_v53 = vmax.f32 %v544_v49, 0.0  ;;  %v2546_v54 = vpop.f32.mrb[2].mxu0  ;;  %v2558_v55 = vpop.f32.mrb[2].mxu1 }
 0x139   : > { %2194 = vst.msk [vmem:[%s3144_s14 + $0x3a] sm:$0xff] %vm602_vm3, %v583_v50  ;;  %2202 = vst.msk [vmem:[%s3144_s14 + $0x9a] sm:$0xff] %vm602_vm3, %v591_v51  ;;  %v519_v56 = vadd.f32 %v2546_v54, %v2190_v41  ;;  %v559_v57 = vadd.f32 %v2558_v55, %v2190_v41  ;;  %v513_v58 = vpop.f32.mrb[3].mxu0  ;;  %v553_v59 = vpop.f32.mrb[3].mxu1 }
 0x13a   : > { %2193 = vst.msk [vmem:[%s3144_s14 + $0x32] sm:$0xff] %vm602_vm3, %v582_v52  ;;  %2201 = vst.msk [vmem:[%s3144_s14 + $0x92] sm:$0xff] %vm602_vm3, %v590_v53  ;;  %v514_v60 = vadd.f32 %v2190_v41, %v513_v58  ;;  %v554_v61 = vadd.f32 %v2190_v41, %v553_v59 }
 0x13b   : > { %v585_v62 = vmax.f32 %v519_v56, 0.0  ;;  %v593_v63 = vmax.f32 %v559_v57, 0.0 }
 0x13c   : > { %v584_v0 = vmax.f32 %v514_v60, 0.0  ;;  %v592_v1 = vmax.f32 %v554_v61, 0.0  ;;  %v2549_v2 = vpop.f32.mrb[4].mxu0  ;;  %v2561_v3 = vpop.f32.mrb[4].mxu1 }
 0x13d   : > { %2196 = vst.msk [vmem:[%s3144_s14 + $0x52] sm:$0xff] %vm602_vm3, %v585_v62  ;;  %2204 = vst.msk [vmem:[%s3144_s14 + $0xb2] sm:$0xff] %vm602_vm3, %v593_v63  ;;  %v529_v4 = vadd.f32 %v2549_v2, %v2190_v41  ;;  %v569_v5 = vadd.f32 %v2561_v3, %v2190_v41  ;;  %v523_v6 = vpop.f32.mrb[5].mxu0  ;;  %v563_v7 = vpop.f32.mrb[5].mxu1 }
 0x13e   : > { %2195 = vst.msk [vmem:[%s3144_s14 + $0x4a] sm:$0xff] %vm602_vm3, %v584_v0  ;;  %2203 = vst.msk [vmem:[%s3144_s14 + $0xaa] sm:$0xff] %vm602_vm3, %v592_v1  ;;  %v524_v8 = vadd.f32 %v2190_v41, %v523_v6  ;;  %v564_v9 = vadd.f32 %v2190_v41, %v563_v7 }
 0x13f   : > { %v587_v10 = vmax.f32 %v529_v4, 0.0  ;;  %v595_v11 = vmax.f32 %v569_v5, 0.0 }
 0x140   : > { %v586_v12 = vmax.f32 %v524_v8, 0.0  ;;  %v594_v13 = vmax.f32 %v564_v9, 0.0  ;;  %v2552_v14 = vpop.f32.mrb[6].mxu0  ;;  %v2564_v15 = vpop.f32.mrb[6].mxu1 }
 0x141   : > { %2198 = vst.msk [vmem:[%s3144_s14 + $0x6a] sm:$0xff] %vm602_vm3, %v587_v10  ;;  %2206 = vst.msk [vmem:[%s3144_s14 + $0xca] sm:$0xff] %vm602_vm3, %v595_v11  ;;  %v539_v16 = vadd.f32 %v2552_v14, %v2190_v41  ;;  %v579_v17 = vadd.f32 %v2564_v15, %v2190_v41  ;;  %v533_v18 = vpop.f32.mrb[7].mxu0  ;;  %v573_v19 = vpop.f32.mrb[7].mxu1 }
 0x142   : > { %2197 = vst.msk [vmem:[%s3144_s14 + $0x62] sm:$0xff] %vm602_vm3, %v586_v12  ;;  %2205 = vst.msk [vmem:[%s3144_s14 + $0xc2] sm:$0xff] %vm602_vm3, %v594_v13  ;;  %v534_v20 = vadd.f32 %v2190_v41, %v533_v18  ;;  %v574_v21 = vadd.f32 %v2190_v41, %v573_v19 }
 0x143   : > { %v589_v22 = vmax.f32 %v539_v16, 0.0  ;;  %v597_v23 = vmax.f32 %v579_v17, 0.0 }
 0x144   : > { %v588_v24 = vmax.f32 %v534_v20, 0.0  ;;  %v596_v25 = vmax.f32 %v574_v21, 0.0 }
 0x145   : > { %2200 = vst.msk [vmem:[%s3144_s14 + $0x82] sm:$0xff] %vm602_vm3, %v589_v22  ;;  %2208 = vst.msk [vmem:[%s3144_s14 + $0xe2] sm:$0xff] %vm602_vm3, %v597_v23 }
 0x146   : > { %2199 = vst.msk [vmem:[%s3144_s14 + $0x7a] sm:$0xff] %vm602_vm3, %v588_v24  ;;  %2207 = vst.msk [vmem:[%s3144_s14 + $0xda] sm:$0xff] %vm602_vm3, %v596_v25 }
 0x147 PF: > { %622 = sbr.rel (%p315_p0) target bundleno = 1087 (0x43f), region = 60  ;;  %s2210_s15 = sadd.s32 (!%p315_p0), 4294967295, %s2880_s27  ;;  %v1373_v26 = vld [vmem:[%s4038_s3 + $0x80] sm:$0xff] (!%p315_p0)  ;;  %v1374_v27 = vld [vmem:[%s4038_s3 + $0x88] sm:$0xff] (!%p315_p0)  ;;  %v1375_v31 = vld [vmem:[%s4038_s3 + $0x90] sm:$0xff] (!%p315_p0)  ;;  %vm643_vm4 = vcmask (!%p315_p0), 261120  }
 0x148   : > { %v1357_v28 = vld [vmem:[%s4038_s3] sm:$0xff] (!%p315_p0)  ;;  %s2212_s10 = smul.u32 (!%p315_p0), 192, %s2210_s15  ;;  %v2661_v29 = vpack.c.bf16 (!%p315_p0), %v1374_v27, %v1373_v26  ;;  %v1358_v30 = vld [vmem:[%s4038_s3 + $0x8] sm:$0xff] (!%p315_p0)  ;;  %v1376_v32 = vld [vmem:[%s4038_s3 + $0x98] sm:$0xff] (!%p315_p0)  ;;  %s2900_s18 = smov (!%p315_p0), 64   ;;  %vm740_vm5 = vcmask (!%p315_p0), 523520  }
 0x149   : > { %v2663_v33 = vpack.c.bf16 (!%p315_p0), %v1358_v30, %v1357_v28  ;;  %v2665_v34 = vpack.c.bf16 (!%p315_p0), %v1376_v32, %v1375_v31  ;;  %v1359_v35 = vld [vmem:[%s4038_s3 + $0x10] sm:$0xff] (!%p315_p0)  ;;  %v1360_v36 = vld [vmem:[%s4038_s3 + $0x18] sm:$0xff] (!%p315_p0)  ;;  %v1377_v37 = vld [vmem:[%s4038_s3 + $0xa0] sm:$0xff] (!%p315_p0)  ;;  %s2901_s23 = smov (!%p315_p0), 96   ;;  %s4056_s12 = smov (!%p315_p0), 32   ;;  %vm837_vm6 = vcmask (!%p315_p0), 785920  }
 0x14a   : > { %2662 = vmatprep.subr.bf16.mxu0 (!%p315_p0), %v2661_v29  ;;  %v1378_v38 = vld [vmem:[%s4038_s3 + $0xa8] sm:$0xff] (!%p315_p0)  ;;  %s3211_s14 = scalar_lea.vmem (!%p315_p0), [#allocation2], %s2212_s10  ;;  %v2667_v41 = vpack.c.bf16 (!%p315_p0), %v1360_v36, %v1359_v35  ;;  %v1361_v42 = vld [vmem:[%s4038_s3 + $0x20] sm:$0xff] (!%p315_p0)  ;;  %s4047_s10 = smov (!%p315_p0), 32   ;;  %v1379_v14 = vld [vmem:[%s4038_s3 + $0xb0] sm:$0xff] (!%p315_p0)  ;;  %vm937_vm7 = vcmask (!%p315_p0), 1048320  }
 0x14b   : > { %2664 = vmatpush3.bf16.msra.mxu0 (!%p315_p0), %v2663_v33  ;;  %v1362_v44 = vld [vmem:[%s4038_s3 + $0x28] sm:$0xff] (!%p315_p0)  ;;  %v2669_v48 = vpack.c.bf16 (!%p315_p0), %v1378_v38, %v1377_v37  ;;  %v1380_v15 = vld [vmem:[%s4038_s3 + $0xb8] sm:$0xff] (!%p315_p0)  ;;  %v1363_v17 = vld [vmem:[%s4038_s3 + $0x30] sm:$0xff] (!%p315_p0) }
 0x14c   : > { %2666 = vmatprep.subr.bf16.mxu0 (!%p315_p0), %v2665_v34  ;;  %v2671_v52 = vpack.c.bf16 (!%p315_p0), %v1362_v44, %v1361_v42  ;;  %v2673_v16 = vpack.c.bf16 (!%p315_p0), %v1380_v15, %v1379_v14  ;;  %v1364_v18 = vld [vmem:[%s4038_s3 + $0x38] sm:$0xff] (!%p315_p0)  ;;  %v1381_v21 = vld [vmem:[%s4038_s3 + $0xc0] sm:$0xff] (!%p315_p0)  ;;  %v1382_v22 = vld [vmem:[%s4038_s3 + $0xc8] sm:$0xff] (!%p315_p0) }
 0x14d   : > { %v3214_v39 = vld [vmem:[%s3211_s14 + $0x34] sm:$0xff] (!%p315_p0)  ;;  %v3217_v40 = vld [vmem:[%s3211_s14 + $0x60] sm:$0xff] (!%p315_p0)  ;;  %v3240_v49 = vld [vmem:[%s3211_s14 + $0x68] sm:$0xff] (!%p315_p0)  ;;  %v2675_v20 = vpack.c.bf16 (!%p315_p0), %v1364_v18, %v1363_v17  ;;  %v2677_v24 = vpack.c.bf16 (!%p315_p0), %v1382_v22, %v1381_v21 }
 0x14e   : > { %1018 = vrot.lane.b32.xlu0 %v3214_v39, %s4047_s10  ;;  %1117 = vrot.lane.b32.xlu1 %v3217_v40, %s2900_s18  ;;  %v3227_v43 = vld [vmem:[%s3211_s14 + $0x62] sm:$0xff]  ;;  %652 = vst.msk [vmem:[#allocation3 + $0xc0] sm:$0xff] %vm643_vm4, %v3217_v40  ;;  %v2215_v47 = vld [vmem:[%s3211_s14 + $0x30] sm:$0xff]  ;;  %653 = vst.msk [vmem:[#allocation3 + $0xd8] sm:$0xff] %vm643_vm4, %v3240_v49 }
 0x14f   : > { %v660_v45 = vld [vmem:[%s3211_s14 + $0x2] sm:$0xff]  ;;  %974 = vst.msk [vmem:[#allocation3 + $0x68] sm:$0xff] %vm643_vm4, %v3227_v43  ;;  %v3243_v50 = vld [vmem:[%s3211_s14 + $0x6a] sm:$0xff]  ;;  %648 = vst.msk [vmem:[#allocation3 + $0x60] sm:$0xff] %vm643_vm4, %v2215_v47  ;;  %2668 = vmatpush3.bf16.msra.mxu0 %v2667_v41 }
 0x150   : > { %v757_v46 = vld [vmem:[%s3211_s14 + $0x4] sm:$0xff]  ;;  %v3247_v51 = vld [vmem:[%s3211_s14 + $0x38] sm:$0xff]  ;;  %975 = vst.msk [vmem:[#allocation3 + $0x80] sm:$0xff] %vm643_vm4, %v3243_v50  ;;  %2670 = vmatprep.subr.bf16.mxu0 %v2669_v48  ;;  %v3283_v60 = vld [vmem:[%s3211_s14 + $0x50] sm:$0xff] }
 0x151   : > { %v3256_v53 = vld [vmem:[%s3211_s14 + $0x78] sm:$0xff]  ;;  %649 = vst.msk [vmem:[#allocation3 + $0x78] sm:$0xff] %vm643_vm4, %v3247_v51  ;;  %v3264_v55 = vld [vmem:[%s3211_s14 + $0x48] sm:$0xff]  ;;  %v3269_v56 = vld [vmem:[%s3211_s14 + $0x80] sm:$0xff] }
 0x152   : > { %692 = vrot.lane.b32.xlu0 %v660_v45, %s4047_s10  ;;  %789 = vrot.lane.b32.xlu1 %v757_v46, %s2900_s18  ;;  %v3261_v54 = vld [vmem:[%s3211_s14 + $0x7a] sm:$0xff]  ;;  %654 = vst.msk [vmem:[#allocation3 + $0xf0] sm:$0xff] %vm643_vm4, %v3256_v53  ;;  %650 = vst.msk [vmem:[#allocation3 + $0x90] sm:$0xff] %vm643_vm4, %v3264_v55  ;;  %v661_v58 = vld [vmem:[%s3211_s14 + $0xa] sm:$0xff] }
 0x153   : > { %976 = vst.msk [vmem:[#allocation3 + $0x98] sm:$0xff] %vm643_vm4, %v3261_v54  ;;  %v3276_v57 = vld [vmem:[%s3211_s14 + $0x3c] sm:$0xff]  ;;  %v3286_v61 = vld [vmem:[%s3211_s14 + $0x64] sm:$0xff]  ;;  %2672 = vmatpush3.bf16.msra.mxu0 %v2671_v52  ;;  %655 = vst.msk [vmem:[#allocation3 + $0x108] sm:$0xff] %vm643_vm4, %v3269_v56 }
 0x154   : > { %v3280_v59 = vld [vmem:[%s3211_s14 + $0x82] sm:$0xff]  ;;  %v3294_v62 = vld [vmem:[%s3211_s14 + $0x32] sm:$0xff]  ;;  %1293 = vst.msk [vmem:[#allocation3 + $0x10] sm:$0xff] %vm643_vm4, %v3286_v61  ;;  %651 = vst.msk [vmem:[#allocation3 + $0xa8] sm:$0xff] %vm643_vm4, %v3283_v60  ;;  %2674 = vmatprep.subr.bf16.mxu0 %v2673_v16 }
 0x155   : > { %v3297_v63 = vld [vmem:[%s3211_s14 + $0x90] sm:$0xff]  ;;  %977 = vst.msk [vmem:[#allocation3 + $0xb0] sm:$0xff] %vm643_vm4, %v3280_v59  ;;  %v3312_v2 = vld [vmem:[%s3211_s14 + $0x3a] sm:$0xff]  ;;  %970 = vst.msk [vmem:[#allocation3 + $0x8] sm:$0xff] %vm643_vm4, %v3294_v62 }
 0x156   : > { %1213 = vrot.lane.b32.xlu0 %v3227_v43, %s2901_s23  ;;  %889 = vrot.lane.b32.xlu1 %v2215_v47, %s2901_s23  ;;  %v3306_v0 = vld [vmem:[%s3211_s14 + $0x92] sm:$0xff]  ;;  %656 = vst.msk [vmem:[#allocation3 + $0x120] sm:$0xff] %vm643_vm4, %v3297_v63  ;;  %v3319_v3 = vld [vmem:[%s3211_s14 + $0x9a] sm:$0xff]  ;;  %971 = vst.msk [vmem:[#allocation3 + $0x20] sm:$0xff] %vm643_vm4, %v3312_v2 }
 0x157   : > { %v3309_v1 = vld [vmem:[%s3211_s14 + $0x6c] sm:$0xff]  ;;  %v3322_v4 = vld [vmem:[%s3211_s14 + $0x7c] sm:$0xff]  ;;  %978 = vst.msk [vmem:[#allocation3 + $0xc8] sm:$0xff] %vm643_vm4, %v3306_v0  ;;  %979 = vst.msk [vmem:[#allocation3 + $0xe0] sm:$0xff] %vm643_vm4, %v3319_v3  ;;  %2676 = vmatpush3.bf16.msra.mxu0 %v2675_v20 }
 0x158   : > { %1294 = vst.msk [vmem:[#allocation3 + $0x28] sm:$0xff] %vm643_vm4, %v3309_v1  ;;  %v3331_v5 = vld [vmem:[%s3211_s14 + $0x4a] sm:$0xff]  ;;  %1295 = vst.msk [vmem:[#allocation3 + $0x40] sm:$0xff] %vm643_vm4, %v3322_v4  ;;  %v3347_v8 = vld [vmem:[%s3211_s14 + $0x52] sm:$0xff]  ;;  %2678 = vmatprep.subr.bf16.mxu0 %v2677_v24 }
 0x159   : > { %v3334_v6 = vld [vmem:[%s3211_s14 + $0xaa] sm:$0xff]  ;;  %972 = vst.msk [vmem:[#allocation3 + $0x38] sm:$0xff] %vm643_vm4, %v3331_v5  ;;  %v3355_v10 = vld [vmem:[%s3211_s14 + $0xb2] sm:$0xff]  ;;  %973 = vst.msk [vmem:[#allocation3 + $0x50] sm:$0xff] %vm643_vm4, %v3347_v8 }
 0x15a   : > { %1020 = vrot.lane.b32.xlu0 %v3276_v57, %s4047_s10  ;;  %694 = vrot.lane.b32.xlu1 %v661_v58, %s4047_s10  ;;  %v3344_v7 = vld [vmem:[%s3211_s14 + $0x84] sm:$0xff]  ;;  %980 = vst.msk [vmem:[#allocation3 + $0xf8] sm:$0xff] %vm643_vm4, %v3334_v6  ;;  %v758_v9 = vld [vmem:[%s3211_s14 + $0xc] sm:$0xff]  ;;  %981 = vst.msk [vmem:[#allocation3 + $0x110] sm:$0xff] %vm643_vm4, %v3355_v10 }
 0x15b   : > { %v3358_v11 = vld [vmem:[%s3211_s14 + $0x94] sm:$0xff]  ;;  %1296 = vst.msk [vmem:[#allocation3 + $0x58] sm:$0xff] %vm643_vm4, %v3344_v7  ;;  %v3365_v12 = vld [vmem:[%s3211_s14 + $0xc2] sm:$0xff]  ;;  %v3400_v23 = vld [vmem:[%s3211_s14 + $0xca] sm:$0xff] }
 0x15c   : > { %v3368_v13 = vld [vmem:[%s3211_s14 + $0x9c] sm:$0xff]  ;;  %1297 = vst.msk [vmem:[#allocation3 + $0x70] sm:$0xff] %vm643_vm4, %v3358_v11  ;;  %982 = vst.msk [vmem:[#allocation3 + $0x128] sm:$0xff] %vm643_vm4, %v3365_v12  ;;  %v1311_v19 = vld [vmem:[#allocation3 + $0x10] sm:$0xff] }
 0x15d   : > { %1298 = vst.msk [vmem:[#allocation3 + $0x88] sm:$0xff] %vm643_vm4, %v3368_v13  ;;  %2573 = vmatprep.mubr.msk.f32.mxu1 %vm643_vm4, %v1311_v19  ;;  %v1365_v25 = vld [vmem:[%s4038_s3 + $0x40] sm:$0xff]  ;;  %v1366_v26 = vld [vmem:[%s4038_s3 + $0x48] sm:$0xff]  ;;  %983 = vst.msk [vmem:[#allocation3 + $0x140] sm:$0xff] %vm643_vm4, %v3400_v23 }
 0x15e   : > { %1119 = vrot.lane.b32.xlu0 %v3240_v49, %s2900_s18  ;;  %791 = vrot.lane.b32.xlu1 %v758_v9, %s2900_s18  ;;  %v627_v27 = vld [vmem:[%s3211_s14] sm:$0xff]  ;;  %v2679_v28 = vpack.c.bf16 %v1366_v26, %v1365_v25  ;;  %v1383_v29 = vld [vmem:[%s4038_s3 + $0xd0] sm:$0xff] }
 0x15f   : > { %644 = vst.msk [vmem:[#allocation3] sm:$0xff] %vm643_vm4, %v627_v27  ;;  %v1384_v30 = vld [vmem:[%s4038_s3 + $0xd8] sm:$0xff]  ;;  %v3420_v31 = vld [vmem:[%s3211_s14 + $0xac] sm:$0xff]  ;;  %v1385_v37 = vld [vmem:[%s4038_s3 + $0xe0] sm:$0xff] }
 0x160   : > { %v1367_v32 = vld [vmem:[%s4038_s3 + $0x50] sm:$0xff]  ;;  %v1368_v33 = vld [vmem:[%s4038_s3 + $0x58] sm:$0xff]  ;;  %1299 = vst.msk [vmem:[#allocation3 + $0xa0] sm:$0xff] %vm643_vm4, %v3420_v31  ;;  %v2681_v36 = vpack.c.bf16 %v1384_v30, %v1383_v29  ;;  %v1386_v38 = vld [vmem:[%s4038_s3 + $0xe8] sm:$0xff]  ;;  %2680 = vmatpush3.bf16.msra.mxu0 %v2679_v28 }
 0x161   : > { %v3435_v34 = vld [vmem:[%s3211_s14 + $0x4c] sm:$0xff]  ;;  %v662_v35 = vld [vmem:[%s3211_s14 + $0x1a] sm:$0xff]  ;;  %v2683_v44 = vpack.c.bf16 %v1368_v33, %v1367_v32  ;;  %v2685_v52 = vpack.c.bf16 %v1386_v38, %v1385_v37  ;;  %v3487_v22 = vld [vmem:[%s3211_s14 + $0xe2] sm:$0xff] }
 0x162   : > { %1215 = vrot.lane.b32.xlu0 %v3243_v50, %s2901_s23  ;;  %891 = vrot.lane.b32.xlu1 %v3247_v51, %s2901_s23  ;;  %v628_v41 = vld [vmem:[%s3211_s14 + $0x8] sm:$0xff]  ;;  %v759_v42 = vld [vmem:[%s3211_s14 + $0x1c] sm:$0xff]  ;;  %985 = vst.msk [vmem:[#allocation3 + $0x170] sm:$0xff] %vm643_vm4, %v3487_v22 }
 0x163   : > { %v1369_v45 = vld [vmem:[%s4038_s3 + $0x60] sm:$0xff]  ;;  %v1370_v46 = vld [vmem:[%s4038_s3 + $0x68] sm:$0xff]  ;;  %645 = vst.msk [vmem:[#allocation3 + $0x18] sm:$0xff] %vm643_vm4, %v628_v41  ;;  %2682 = vmatprep.subr.bf16.mxu0 %v2681_v36  ;;  %v1387_v58 = vld [vmem:[%s4038_s3 + $0xf0] sm:$0xff] }
 0x164   : > { %v1389_v47 = vld [vmem:[%s4038_s3 + $0x100] sm:$0xff]  ;;  %v1390_v48 = vld [vmem:[%s4038_s3 + $0x108] sm:$0xff]  ;;  %v1388_v9 = vld [vmem:[%s4038_s3 + $0xf8] sm:$0xff]  ;;  %2684 = vmatpush3.bf16.msra.mxu0 %v2683_v44  ;;  %v2687_v19 = vpack.c.bf16 %v1370_v46, %v1369_v45 }
 0x165   : > { %v3463_v51 = vld [vmem:[%s3211_s14 + $0xda] sm:$0xff]  ;;  %v2693_v14 = vpack.c.bf16 %v1390_v48, %v1389_v47  ;;  %v1391_v15 = vld [vmem:[%s4038_s3 + $0x110] sm:$0xff]  ;;  %v3490_v24 = vld [vmem:[%s3211_s14 + $0xc4] sm:$0xff]  ;;  %2686 = vmatprep.subr.bf16.mxu0 %v2685_v52  ;;  %v2689_v27 = vpack.c.bf16 %v1388_v9, %v1387_v58 }
 0x166   : > { %1022 = vrot.lane.b32.xlu0 %v3435_v34, %s4047_s10  ;;  %696 = vrot.lane.b32.xlu1 %v662_v35, %s4047_s10  ;;  %984 = vst.msk [vmem:[#allocation3 + $0x158] sm:$0xff] %vm643_vm4, %v3463_v51  ;;  %v1371_v16 = vld [vmem:[%s4038_s3 + $0x70] sm:$0xff]  ;;  %v1392_v17 = vld [vmem:[%s4038_s3 + $0x118] sm:$0xff]  ;;  %1301 = vst.msk [vmem:[#allocation3 + $0xd0] sm:$0xff] %vm643_vm4, %v3490_v24 }
 0x167   : > { %v3483_v18 = vld [vmem:[%s3211_s14 + $0xb4] sm:$0xff]  ;;  %2694 = vmatprep.subr.bf16.mxu1 %v2693_v14  ;;  %v2697_v20 = vpack.c.bf16 %v1392_v17, %v1391_v15  ;;  %v630_v26 = vld [vmem:[%s3211_s14 + $0x20] sm:$0xff]  ;;  %v3508_v28 = vld [vmem:[%s3211_s14 + $0xcc] sm:$0xff] }
 0x168   : > { %v629_v21 = vld [vmem:[%s3211_s14 + $0x18] sm:$0xff]  ;;  %1300 = vst.msk [vmem:[#allocation3 + $0xb8] sm:$0xff] %vm643_vm4, %v3483_v18  ;;  %2696 = vmatpush3.bf16.msra.mxu1 %v2693_v14  ;;  %647 = vst.msk [vmem:[#allocation3 + $0x48] sm:$0xff] %vm643_vm4, %v630_v26  ;;  %2688 = vmatpush3.bf16.msra.mxu0 %v2687_v19  ;;  %v663_v32 = vld [vmem:[%s3211_s14 + $0x22] sm:$0xff] }
 0x169   : > { %v1372_v25 = vld [vmem:[%s4038_s3 + $0x78] sm:$0xff]  ;;  %646 = vst.msk [vmem:[#allocation3 + $0x30] sm:$0xff] %vm643_vm4, %v629_v21  ;;  %2698 = vmatprep.subr.bf16.mxu1 %v2697_v20  ;;  %1302 = vst.msk [vmem:[#allocation3 + $0xe8] sm:$0xff] %vm643_vm4, %v3508_v28  ;;  %2690 = vmatprep.subr.bf16.mxu0 %v2689_v27  ;;  %v1314_v33 = vld [vmem:[#allocation3 + $0x28] sm:$0xff] }
 0x16a   : > { %1121 = vrot.lane.b32.xlu0 %v3256_v53, %s2900_s18  ;;  %793 = vrot.lane.b32.xlu1 %v759_v42, %s2900_s18  ;;  %v2691_v29 = vpack.c.bf16 %v1372_v25, %v1371_v16  ;;  %v2250_v30 = vld [vmem:[%s3211_s14 + $0x54] sm:$0xff]  ;;  %v1317_v35 = vld [vmem:[#allocation3 + $0x40] sm:$0xff] }
 0x16b   : > { %v760_v36 = vld [vmem:[%s3211_s14 + $0x24] sm:$0xff]  ;;  %v1320_v37 = vld [vmem:[#allocation3 + $0x58] sm:$0xff]  ;;  %v1323_v41 = vld [vmem:[#allocation3 + $0x70] sm:$0xff] }
 0x16c   : > { %2700 = vmatpush3.bf16.msra.mxu1 %v2697_v20  ;;  %2692 = vmatpush3.bf16.msra.mxu0 %v2691_v29  ;;  %v3524_v38 = vld [vmem:[%s3211_s14 + $0xdc] sm:$0xff]  ;;  %v2309_v16 = vld [vmem:[%s3211_s14 + $0xf4] sm:$0xff] }
 0x16d   : > { %1303 = vst.msk [vmem:[#allocation3 + $0x100] sm:$0xff] %vm643_vm4, %v3524_v38  ;;  %v3657_v47 = vld [vmem:[%s3211_s14 + $0xe0] sm:$0xff]  ;;  %1305 = vst.msk [vmem:[#allocation3 + $0x130] sm:$0xff] %vm643_vm4, %v2309_v16  ;;  %v2277_v19 = vld [vmem:[%s3211_s14 + $0xf0] sm:$0xff] }
 0x16e   : > { %1217 = vrot.lane.b32.xlu0 %v3261_v54, %s2901_s23  ;;  %893 = vrot.lane.b32.xlu1 %v3264_v55, %s2901_s23  ;;  %v3541_v55 = vld [vmem:[%s3211_s14 + $0xe4] sm:$0xff]  ;;  %v2310_v17 = vld [vmem:[%s3211_s14 + $0xfc] sm:$0xff] }
 0x16f   : > { %2574 = vmatmul.mubr.msk.f32.vlgmr.msra.gmra.mrb[0].mxu1 %vm643_vm4, %v1314_v33  ;;  %1304 = vst.msk [vmem:[#allocation3 + $0x118] sm:$0xff] %vm643_vm4, %v3541_v55  ;;  %1306 = vst.msk [vmem:[#allocation3 + $0x148] sm:$0xff] %vm643_vm4, %v2310_v17  ;;  %v2278_v33 = vld [vmem:[%s3211_s14 + $0xf8] sm:$0xff] }
 0x170   : > { %2576 = vmatprep.mubr.msk.f32.mxu1 %vm643_vm4, %v1317_v35 }
 0x172   : > { %1024 = vrot.lane.b32.xlu0 %v2250_v30, %s4056_s12  ;;  %698 = vrot.lane.b32.xlu1 %v663_v32, %s4056_s12  ;;  %v641_v32 = vld [vmem:[%s3211_s14 + $0xa8] sm:$0xff] }
 0x173   : > { %2577 = vmatmul.mubr.msk.f32.gmra.mrb[2].mxu1 %vm643_vm4, %v1320_v37  ;;  %658 = vst.msk [vmem:[#allocation3 + $0x150] sm:$0xff] %vm643_vm4, %v641_v32  ;;  %v2294_v37 = vld [vmem:[%s3211_s14 + $0xfa] sm:$0xff] }
 0x174   : > { %2579 = vmatprep.mubr.msk.f32.mxu1 %vm643_vm4, %v1323_v41  ;;  %v1341_v42 = vld [vmem:[#allocation3 + $0x100] sm:$0xff] }
 0x176   : > { %1123 = vrot.lane.b32.xlu0 %v3269_v56, %s2900_s18  ;;  %795 = vrot.lane.b32.xlu1 %v760_v36, %s2900_s18  ;;  %v1350_v26 = vld [vmem:[#allocation3 + $0x148] sm:$0xff] }
 0x17a   : > { %1219 = vrot.lane.b32.xlu0 %v3280_v59, %s2901_s23  ;;  %895 = vrot.lane.b32.xlu1 %v3283_v60, %s2901_s23  ;;  %v1326_v60 = vld [vmem:[#allocation3 + $0x88] sm:$0xff] }
 0x17b   : > { %2580 = vmatmul.mubr.msk.f32.gmra.mrb[4].mxu1 %vm643_vm4, %v1326_v60 }
 0x17e   : > { %1026 = vrot.lane.b32.xlu0 %v3286_v61, %s4056_s12  ;;  %700 = vrot.lane.b32.xlu1 %v3294_v62, %s4056_s12  ;;  %v1332_v62 = vld [vmem:[#allocation3 + $0xb8] sm:$0xff] }
 0x182   : > { %1125 = vrot.lane.b32.xlu0 %v3297_v63, %s2900_s18  ;;  %797 = vrot.lane.b32.xlu1 %v3214_v39, %s2900_s18  ;;  %v2270_v39 = vld [vmem:[%s3211_s14 + $0x98] sm:$0xff] }
 0x186   : > { %1221 = vrot.lane.b32.xlu0 %v3306_v0, %s2901_s23  ;;  %897 = vrot.lane.b32.xlu1 %v3217_v40, %s2901_s23  ;;  %v2271_v40 = vld [vmem:[%s3211_s14 + $0xa8] sm:$0xff] }
 0x18a   : > { %1028 = vrot.lane.b32.xlu0 %v3309_v1, %s4056_s12  ;;  %702 = vrot.lane.b32.xlu1 %v3312_v2, %s4056_s12  ;;  %v1335_v2 = vld [vmem:[#allocation3 + $0xd0] sm:$0xff] }
 0x18e   : > { %1127 = vrot.lane.b32.xlu0 %v2270_v39, %s2900_s18  ;;  %799 = vrot.lane.b32.xlu1 %v3276_v57, %s2900_s18  ;;  %v1329_v57 = vld [vmem:[#allocation3 + $0xa0] sm:$0xff] }
 0x18f   : > { %2582 = vmatprep.mubr.msk.f32.mxu1 %vm643_vm4, %v1329_v57  ;;  %v2311_v57 = vld [vmem:[%s3211_s14 + $0x10c] sm:$0xff] }
 0x190   : > { %2583 = vmatmul.mubr.msk.f32.gmra.mrb[6].mxu1 %vm643_vm4, %v1332_v62  ;;  %v2312_v62 = vld [vmem:[%s3211_s14 + $0x114] sm:$0xff]  ;;  %1307 = vst.msk [vmem:[#allocation3 + $0x160] sm:$0xff] %vm643_vm4, %v2311_v57 }
 0x191   : > { %2585 = vmatprep.mubr.msk.f32.mxu1 %vm643_vm4, %v1335_v2  ;;  %1308 = vst.msk [vmem:[#allocation3 + $0x178] sm:$0xff] %vm643_vm4, %v2312_v62 }
 0x192   : > { %1223 = vrot.lane.b32.xlu0 %v3319_v3, %s2901_s23  ;;  %899 = vrot.lane.b32.xlu1 %v3240_v49, %s2901_s23  ;;  %v3586_v49 = vld [vmem:[%s3211_s14 + $0xb0] sm:$0xff] }
 0x196   : > { %1030 = vrot.lane.b32.xlu0 %v3322_v4, %s4056_s12  ;;  %704 = vrot.lane.b32.xlu1 %v3331_v5, %s4056_s12  ;;  %v1338_v5 = vld [vmem:[#allocation3 + $0xe8] sm:$0xff] }
 0x197   : > { %2586 = vmatmul.mubr.msk.f32.gmra.mrb[8].mxu1 %vm643_vm4, %v1338_v5 }
 0x198   : > { %2588 = vmatprep.mubr.msk.f32.mxu1 %vm643_vm4, %v1341_v42 }
 0x19a   : > { %1129 = vrot.lane.b32.xlu0 %v2271_v40, %s2900_s18  ;;  %801 = vrot.lane.b32.xlu1 %v3435_v34, %s2900_s18 }
 0x19e   : > { %1225 = vrot.lane.b32.xlu0 %v3334_v6, %s2901_s23  ;;  %901 = vrot.lane.b32.xlu1 %v3256_v53, %s2901_s23  ;;  %v3600_v53 = vld [vmem:[%s3211_s14 + $0xc0] sm:$0xff] }
 0x1a2   : > { %1032 = vrot.lane.b32.xlu0 %v3344_v7, %s4056_s12  ;;  %706 = vrot.lane.b32.xlu1 %v3347_v8, %s4056_s12 }
 0x1a6   : > { %1131 = vrot.lane.b32.xlu0 %v3586_v49, %s2900_s18  ;;  %803 = vrot.lane.b32.xlu1 %v2250_v30, %s2900_s18 }
 0x1aa   : > { %1227 = vrot.lane.b32.xlu0 %v3355_v10, %s2901_s23  ;;  %903 = vrot.lane.b32.xlu1 %v3269_v56, %s2901_s23 }
 0x1ae   : > { %1034 = vrot.lane.b32.xlu0 %v3358_v11, %s4056_s12  ;;  %708 = vrot.lane.b32.xlu1 %v3227_v43, %s4056_s12  ;;  %v3617_v43 = vld [vmem:[%s3211_s14 + $0xc8] sm:$0xff] }
 0x1b2   : > { %1133 = vrot.lane.b32.xlu0 %v3600_v53, %s2900_s18  ;;  %805 = vrot.lane.b32.xlu1 %v3286_v61, %s2900_s18 }
 0x1b6   : > { %1229 = vrot.lane.b32.xlu0 %v3365_v12, %s2901_s23  ;;  %905 = vrot.lane.b32.xlu1 %v3297_v63, %s2901_s23 }
 0x1ba   : > { %1036 = vrot.lane.b32.xlu0 %v3368_v13, %s4056_s12  ;;  %710 = vrot.lane.b32.xlu1 %v3243_v50, %s4056_s12 }
 0x1be   : > { %1135 = vrot.lane.b32.xlu0 %v3617_v43, %s2900_s18  ;;  %807 = vrot.lane.b32.xlu1 %v3309_v1, %s2900_s18  ;;  %v3635_v1 = vld [vmem:[%s3211_s14 + $0xd8] sm:$0xff] }
 0x1c0   : > { %v1019_v56 = vpop.permute.xlu0 %1018  ;;  %v1118_v61 = vpop.permute.xlu1 %1117 }
 0x1c1   : > { %1066 = vst.msk [vmem:[#allocation3 + $0x8] sm:$0xff] %vm740_vm5, %v1019_v56  ;;  %v1356_v56 = vld [vmem:[#allocation3 + $0x178] sm:$0xff] }
 0x1c2   : > { %1165 = vst.msk [vmem:[#allocation3 + $0x8] sm:$0xff] %vm837_vm6, %v1118_v61  ;;  %1231 = vrot.lane.b32.xlu0 %v3400_v23, %s2901_s23  ;;  %907 = vrot.lane.b32.xlu1 %v2270_v39, %s2901_s23 }
 0x1c4   : > { %v693_v50 = vpop.permute.xlu0 %692  ;;  %v790_v63 = vpop.permute.xlu1 %789 }
 0x1c5   : > { %741 = vst.msk [vmem:[#allocation3] sm:$0xff] %vm740_vm5, %v693_v50 }
 0x1c6   : > { %838 = vst.msk [vmem:[#allocation3] sm:$0xff] %vm837_vm6, %v790_v63  ;;  %1038 = vrot.lane.b32.xlu0 %v3420_v31, %s4056_s12  ;;  %712 = vrot.lane.b32.xlu1 %v3261_v54, %s4056_s12  ;;  %v1344_v54 = vld [vmem:[#allocation3 + $0x118] sm:$0xff] }
 0x1c7   : > { %2589 = vmatmul.mubr.msk.f32.gmra.mrb[10].mxu1 %vm643_vm4, %v1344_v54 }
 0x1c8   : > { %v1214_v8 = vpop.permute.xlu0 %1213  ;;  %v890_v12 = vpop.permute.xlu1 %889 }
 0x1c9   : > { %1261 = vst.msk [vmem:[#allocation3 + $0x8] sm:$0xff] %vm937_vm7, %v1214_v8  ;;  %938 = vst.msk [vmem:[#allocation3] sm:$0xff] %vm937_vm7, %v890_v12 }
 0x1ca   : > { %1137 = vrot.lane.b32.xlu0 %v3635_v1, %s2900_s18  ;;  %809 = vrot.lane.b32.xlu1 %v3322_v4, %s2900_s18 }
 0x1cc   : > { %v1021_v23 = vpop.permute.xlu0 %1020  ;;  %v695_v34 = vpop.permute.xlu1 %694 }
 0x1cd   : > { %1067 = vst.msk [vmem:[#allocation3 + $0x20] sm:$0xff] %vm740_vm5, %v1021_v23  ;;  %742 = vst.msk [vmem:[#allocation3 + $0x18] sm:$0xff] %vm740_vm5, %v695_v34  ;;  %v2296_v23 = vld [vmem:[%s3211_s14 + $0x112] sm:$0xff] }
 0x1ce   : > { %1233 = vrot.lane.b32.xlu0 %v3463_v51, %s2901_s23  ;;  %909 = vrot.lane.b32.xlu1 %v2271_v40, %s2901_s23 }
 0x1d0   : > { %v1120_v44 = vpop.permute.xlu0 %1119  ;;  %v792_v4 = vpop.permute.xlu1 %791  ;;  %v1310_v45 = vld [vmem:[#allocation3 + $0x8] sm:$0xff]  ;;  %v1309_v46 = vld [vmem:[#allocation3] sm:$0xff] }
 0x1d1   : > { %1166 = vst.msk [vmem:[#allocation3 + $0x20] sm:$0xff] %vm837_vm6, %v1120_v44  ;;  %839 = vst.msk [vmem:[#allocation3 + $0x18] sm:$0xff] %vm837_vm6, %v792_v4  ;;  %1512 = vmatprep.mubr.f32.mxu0 %v1310_v45 }
 0x1d2   : > { %1040 = vrot.lane.b32.xlu0 %v3483_v18, %s4056_s12  ;;  %1513 = vmatmul.mubr.f32.vlgmr.msra.gmra.mrb[0].mxu0 %v1309_v46 }
 0x1d3   : > { %714 = vrot.lane.b32.xlu1 %v3280_v59, %s4056_s12 }
 0x1d4   : > { %v1216_v48 = vpop.permute.xlu0 %1215  ;;  %v892_v51 = vpop.permute.xlu1 %891 }
 0x1d5   : > { %1262 = vst.msk [vmem:[#allocation3 + $0x20] sm:$0xff] %vm937_vm7, %v1216_v48  ;;  %939 = vst.msk [vmem:[#allocation3 + $0x18] sm:$0xff] %vm937_vm7, %v892_v51 }
 0x1d6   : > { %1139 = vrot.lane.b32.xlu0 %v3657_v47, %s2900_s18 }
 0x1d7   : > { %811 = vrot.lane.b32.xlu1 %v3344_v7, %s2900_s18  ;;  %v640_v7 = vld [vmem:[%s3211_s14 + $0x98] sm:$0xff] }
 0x1d8   : > { %v1023_v52 = vpop.permute.xlu0 %1022  ;;  %v697_v58 = vpop.permute.xlu1 %696  ;;  %657 = vst.msk [vmem:[#allocation3 + $0x138] sm:$0xff] %vm643_vm4, %v640_v7 }
 0x1d9   : > { %1068 = vst.msk [vmem:[#allocation3 + $0x38] sm:$0xff] %vm740_vm5, %v1023_v52  ;;  %743 = vst.msk [vmem:[#allocation3 + $0x30] sm:$0xff] %vm740_vm5, %v697_v58 }
 0x1da   : > { %1235 = vrot.lane.b32.xlu0 %v3487_v22, %s2901_s23  ;;  %v2293_v22 = vld [vmem:[%s3211_s14 + $0xf2] sm:$0xff] }
 0x1db   : > { %911 = vrot.lane.b32.xlu1 %v3586_v49, %s2901_s23  ;;  %v2279_v49 = vld [vmem:[%s3211_s14 + $0x108] sm:$0xff] }
 0x1dc   : > { %v1122_v59 = vpop.permute.xlu0 %1121  ;;  %v794_v9 = vpop.permute.xlu1 %793  ;;  %v1313_v14 = vld [vmem:[#allocation3 + $0x20] sm:$0xff]  ;;  %v1312_v15 = vld [vmem:[#allocation3 + $0x18] sm:$0xff] }
 0x1dd   : > { %1167 = vst.msk [vmem:[#allocation3 + $0x38] sm:$0xff] %vm837_vm6, %v1122_v59  ;;  %840 = vst.msk [vmem:[#allocation3 + $0x30] sm:$0xff] %vm837_vm6, %v794_v9  ;;  %1517 = vmatprep.mubr.f32.mxu0 %v1313_v14 }
 0x1de   : > { %1042 = vrot.lane.b32.xlu0 %v3490_v24, %s4056_s12  ;;  %1518 = vmatmul.mubr.f32.gmra.mrb[2].mxu0 %v1312_v15 }
 0x1df   : > { %716 = vrot.lane.b32.xlu1 %v3306_v0, %s4056_s12  ;;  %v1347_v0 = vld [vmem:[#allocation3 + $0x130] sm:$0xff] }
 0x1e0   : > { %v1218_v20 = vpop.permute.xlu0 %1217  ;;  %v894_v21 = vpop.permute.xlu1 %893  ;;  %2591 = vmatprep.mubr.msk.f32.mxu1 %vm643_vm4, %v1347_v0 }
 0x1e1   : > { %1263 = vst.msk [vmem:[#allocation3 + $0x38] sm:$0xff] %vm937_vm7, %v1218_v20  ;;  %940 = vst.msk [vmem:[#allocation3 + $0x30] sm:$0xff] %vm937_vm7, %v894_v21  ;;  %2592 = vmatmul.mubr.msk.f32.gmra.mrb[12].mxu1 %vm643_vm4, %v1350_v26 }
 0x1e2   : > { %1141 = vrot.lane.b32.xlu0 %v2277_v19, %s2900_s18 }
 0x1e3   : > { %813 = vrot.lane.b32.xlu1 %v3358_v11, %s2900_s18 }
 0x1e4   : > { %v1025_v24 = vpop.permute.xlu0 %1024  ;;  %v699_v25 = vpop.permute.xlu1 %698 }
 0x1e5   : > { %1069 = vst.msk [vmem:[#allocation3 + $0x50] sm:$0xff] %vm740_vm5, %v1025_v24  ;;  %744 = vst.msk [vmem:[#allocation3 + $0x48] sm:$0xff] %vm740_vm5, %v699_v25 }
 0x1e6   : > { %1237 = vrot.lane.b32.xlu0 %v2293_v22, %s2901_s23 }
 0x1e7   : > { %913 = vrot.lane.b32.xlu1 %v3600_v53, %s2901_s23 }
 0x1e8   : > { %v1124_v11 = vpop.permute.xlu0 %1123  ;;  %v796_v27 = vpop.permute.xlu1 %795  ;;  %v1316_v29 = vld [vmem:[#allocation3 + $0x38] sm:$0xff]  ;;  %v1315_v30 = vld [vmem:[#allocation3 + $0x30] sm:$0xff] }
 0x1e9   : > { %1168 = vst.msk [vmem:[#allocation3 + $0x50] sm:$0xff] %vm837_vm6, %v1124_v11  ;;  %841 = vst.msk [vmem:[#allocation3 + $0x48] sm:$0xff] %vm837_vm6, %v796_v27  ;;  %1522 = vmatprep.mubr.f32.mxu0 %v1316_v29  ;;  %v1754_v11 = vld [vmem:[%s4040_s5] sm:$0xff]  ;;  %v1755_v27 = vld [vmem:[%s4040_s5 + $0x8] sm:$0xff] }
 0x1ea   : > { %1044 = vrot.lane.b32.xlu0 %v3508_v28, %s4056_s12  ;;  %1523 = vmatmul.mubr.f32.gmra.mrb[4].mxu0 %v1315_v30  ;;  %v2701_v29 = vpack.c.bf16 %v1755_v27, %v1754_v11 }
 0x1eb   : > { %718 = vrot.lane.b32.xlu1 %v3319_v3, %s4056_s12 }
 0x1ec   : > { %v1220_v35 = vpop.permute.xlu0 %1219  ;;  %v896_v36 = vpop.permute.xlu1 %895  ;;  %2702 = vmatprep.subr.bf16.mxu1 %v2701_v29 }
 0x1ed   : > { %1264 = vst.msk [vmem:[#allocation3 + $0x50] sm:$0xff] %vm937_vm7, %v1220_v35  ;;  %941 = vst.msk [vmem:[#allocation3 + $0x48] sm:$0xff] %vm937_vm7, %v896_v36  ;;  %v1757_v35 = vld [vmem:[%s4040_s5 + $0x18] sm:$0xff]  ;;  %2704 = vmatpush3.bf16.msra.mxu1 %v2701_v29 }
 0x1ee   : > { %1143 = vrot.lane.b32.xlu0 %v2278_v33, %s2900_s18  ;;  %v1756_v33 = vld [vmem:[%s4040_s5 + $0x10] sm:$0xff] }
 0x1ef   : > { %815 = vrot.lane.b32.xlu1 %v3368_v13, %s2900_s18  ;;  %v642_v13 = vld [vmem:[%s3211_s14 + $0xb0] sm:$0xff]  ;;  %v2705_v36 = vpack.c.bf16 %v1757_v35, %v1756_v33 }
 0x1f0   : > { %v1027_v28 = vpop.permute.xlu0 %1026  ;;  %v701_v41 = vpop.permute.xlu1 %700  ;;  %659 = vst.msk [vmem:[#allocation3 + $0x168] sm:$0xff] %vm643_vm4, %v642_v13 }
 0x1f1   : > { %1070 = vst.msk [vmem:[#allocation3 + $0x68] sm:$0xff] %vm740_vm5, %v1027_v28  ;;  %745 = vst.msk [vmem:[#allocation3 + $0x60] sm:$0xff] %vm740_vm5, %v701_v41  ;;  %2706 = vmatprep.subr.bf16.mxu1 %v2705_v36 }
 0x1f2   : > { %1239 = vrot.lane.b32.xlu0 %v2294_v37, %s2901_s23  ;;  %2708 = vmatpush3.bf16.msra.mxu1 %v2705_v36 }
 0x1f3   : > { %915 = vrot.lane.b32.xlu1 %v3617_v43, %s2901_s23 }
 0x1f4   : > { %v1126_v3 = vpop.permute.xlu0 %1125  ;;  %v798_v60 = vpop.permute.xlu1 %797  ;;  %v1319_v39 = vld [vmem:[#allocation3 + $0x50] sm:$0xff]  ;;  %v1318_v40 = vld [vmem:[#allocation3 + $0x48] sm:$0xff] }
 0x1f5   : > { %1169 = vst.msk [vmem:[#allocation3 + $0x68] sm:$0xff] %vm837_vm6, %v1126_v3  ;;  %842 = vst.msk [vmem:[#allocation3 + $0x60] sm:$0xff] %vm837_vm6, %v798_v60  ;;  %1527 = vmatprep.mubr.f32.mxu0 %v1319_v39 }
 0x1f6   : > { %1046 = vrot.lane.b32.xlu0 %v3524_v38, %s4056_s12  ;;  %1528 = vmatmul.mubr.f32.gmra.mrb[6].mxu0 %v1318_v40  ;;  %v2295_v38 = vld [vmem:[%s3211_s14 + $0x10a] sm:$0xff] }
 0x1f7   : > { %720 = vrot.lane.b32.xlu1 %v3334_v6, %s4056_s12  ;;  %v1353_v6 = vld [vmem:[#allocation3 + $0x160] sm:$0xff] }
 0x1f8   : > { %v1222_v53 = vpop.permute.xlu0 %1221  ;;  %v898_v2 = vpop.permute.xlu1 %897  ;;  %2594 = vmatprep.mubr.msk.f32.mxu1 %vm643_vm4, %v1353_v6 }
 0x1f9   : > { %1265 = vst.msk [vmem:[#allocation3 + $0x68] sm:$0xff] %vm937_vm7, %v1222_v53  ;;  %942 = vst.msk [vmem:[#allocation3 + $0x60] sm:$0xff] %vm937_vm7, %v898_v2  ;;  %2595 = vmatmul.mubr.msk.f32.gmra.mrb[14].mxu1 %vm643_vm4, %v1356_v56 }
 0x1fa   : > { %1145 = vrot.lane.b32.xlu0 %v2279_v49, %s2900_s18 }
 0x1fb   : > { %817 = vrot.lane.b32.xlu1 %v3420_v31, %s2900_s18 }
 0x1fc   : > { %v1029_v5 = vpop.permute.xlu0 %1028  ;;  %v703_v43 = vpop.permute.xlu1 %702 }
 0x1fd   : > { %1071 = vst.msk [vmem:[#allocation3 + $0x80] sm:$0xff] %vm740_vm5, %v1029_v5  ;;  %746 = vst.msk [vmem:[#allocation3 + $0x78] sm:$0xff] %vm740_vm5, %v703_v43 }
 0x1fe   : > { %1241 = vrot.lane.b32.xlu0 %v2295_v38, %s2901_s23 }
 0x1ff   : > { %917 = vrot.lane.b32.xlu1 %v3635_v1, %s2901_s23  ;;  %v2280_v1 = vld [vmem:[%s3211_s14 + $0x110] sm:$0xff] }
 0x200   : > { %v1128_v31 = vpop.permute.xlu0 %1127  ;;  %v800_v61 = vpop.permute.xlu1 %799  ;;  %v1322_v50 = vld [vmem:[#allocation3 + $0x68] sm:$0xff]  ;;  %v1321_v63 = vld [vmem:[#allocation3 + $0x60] sm:$0xff] }
 0x201   : > { %1170 = vst.msk [vmem:[#allocation3 + $0x80] sm:$0xff] %vm837_vm6, %v1128_v31  ;;  %843 = vst.msk [vmem:[#allocation3 + $0x78] sm:$0xff] %vm837_vm6, %v800_v61  ;;  %1532 = vmatprep.mubr.f32.mxu0 %v1322_v50 }
 0x202   : > { %1048 = vrot.lane.b32.xlu0 %v3541_v55, %s4056_s12  ;;  %1533 = vmatmul.mubr.f32.gmra.mrb[8].mxu0 %v1321_v63 }
 0x203   : > { %722 = vrot.lane.b32.xlu1 %v3355_v10, %s4056_s12 }
 0x204   : > { %v1224_v8 = vpop.permute.xlu0 %1223  ;;  %v900_v12 = vpop.permute.xlu1 %899 }
 0x205   : > { %1266 = vst.msk [vmem:[#allocation3 + $0x80] sm:$0xff] %vm937_vm7, %v1224_v8  ;;  %943 = vst.msk [vmem:[#allocation3 + $0x78] sm:$0xff] %vm937_vm7, %v900_v12 }
 0x206   : > { %1147 = vrot.lane.b32.xlu0 %v2280_v1, %s2900_s18 }
 0x207   : > { %819 = vrot.lane.b32.xlu1 %v3483_v18, %s2900_s18 }
 0x208   : > { %v1031_v34 = vpop.permute.xlu0 %1030  ;;  %v705_v42 = vpop.permute.xlu1 %704 }
 0x209   : > { %1072 = vst.msk [vmem:[#allocation3 + $0x98] sm:$0xff] %vm740_vm5, %v1031_v34  ;;  %747 = vst.msk [vmem:[#allocation3 + $0x90] sm:$0xff] %vm740_vm5, %v705_v42 }
 0x20a   : > { %1243 = vrot.lane.b32.xlu0 %v2296_v23, %s2901_s23 }
 0x20b   : > { %919 = vrot.lane.b32.xlu1 %v3657_v47, %s2901_s23 }
 0x20c   : > { %v1130_v10 = vpop.permute.xlu0 %1129  ;;  %v802_v55 = vpop.permute.xlu1 %801  ;;  %v1325_v54 = vld [vmem:[#allocation3 + $0x80] sm:$0xff]  ;;  %v1324_v44 = vld [vmem:[#allocation3 + $0x78] sm:$0xff] }
 0x20d   : > { %1171 = vst.msk [vmem:[#allocation3 + $0x98] sm:$0xff] %vm837_vm6, %v1130_v10  ;;  %844 = vst.msk [vmem:[#allocation3 + $0x90] sm:$0xff] %vm837_vm6, %v802_v55  ;;  %1537 = vmatprep.mubr.f32.mxu0 %v1325_v54 }
 0x20e   : > { %1538 = vmatmul.mubr.f32.gmra.mrb[10].mxu0 %v1324_v44 }
 0x210   : > { %v1226_v18 = vpop.permute.xlu0 %1225  ;;  %v902_v4 = vpop.permute.xlu1 %901 }
 0x211   : > { %1267 = vst.msk [vmem:[#allocation3 + $0x98] sm:$0xff] %vm937_vm7, %v1226_v18  ;;  %944 = vst.msk [vmem:[#allocation3 + $0x90] sm:$0xff] %vm937_vm7, %v902_v4 }
 0x214   : > { %v1033_v45 = vpop.permute.xlu0 %1032  ;;  %v707_v46 = vpop.permute.xlu1 %706 }
 0x215   : > { %1073 = vst.msk [vmem:[#allocation3 + $0xb0] sm:$0xff] %vm740_vm5, %v1033_v45  ;;  %748 = vst.msk [vmem:[#allocation3 + $0xa8] sm:$0xff] %vm740_vm5, %v707_v46 }
 0x218   : > { %v1132_v47 = vpop.permute.xlu0 %1131  ;;  %v804_v48 = vpop.permute.xlu1 %803  ;;  %v1328_v51 = vld [vmem:[#allocation3 + $0x98] sm:$0xff]  ;;  %v1327_v52 = vld [vmem:[#allocation3 + $0x90] sm:$0xff] }
 0x219   : > { %1172 = vst.msk [vmem:[#allocation3 + $0xb0] sm:$0xff] %vm837_vm6, %v1132_v47  ;;  %845 = vst.msk [vmem:[#allocation3 + $0xa8] sm:$0xff] %vm837_vm6, %v804_v48  ;;  %1542 = vmatprep.mubr.f32.mxu0 %v1328_v51 }
 0x21a   : > { %1543 = vmatmul.mubr.f32.gmra.mrb[12].mxu0 %v1327_v52 }
 0x21c   : > { %v1228_v58 = vpop.permute.xlu0 %1227  ;;  %v904_v59 = vpop.permute.xlu1 %903 }
 0x21d   : > { %1268 = vst.msk [vmem:[#allocation3 + $0xb0] sm:$0xff] %vm937_vm7, %v1228_v58  ;;  %945 = vst.msk [vmem:[#allocation3 + $0xa8] sm:$0xff] %vm937_vm7, %v904_v59 }
 0x220   : > { %v1035_v9 = vpop.permute.xlu0 %1034  ;;  %v709_v14 = vpop.permute.xlu1 %708 }
 0x221   : > { %1074 = vst.msk [vmem:[#allocation3 + $0xc8] sm:$0xff] %vm740_vm5, %v1035_v9  ;;  %749 = vst.msk [vmem:[#allocation3 + $0xc0] sm:$0xff] %vm740_vm5, %v709_v14 }
 0x224   : > { %v1134_v15 = vpop.permute.xlu0 %1133  ;;  %v806_v7 = vpop.permute.xlu1 %805  ;;  %v1331_v16 = vld [vmem:[#allocation3 + $0xb0] sm:$0xff]  ;;  %v1330_v17 = vld [vmem:[#allocation3 + $0xa8] sm:$0xff] }
 0x225   : > { %1173 = vst.msk [vmem:[#allocation3 + $0xc8] sm:$0xff] %vm837_vm6, %v1134_v15  ;;  %846 = vst.msk [vmem:[#allocation3 + $0xc0] sm:$0xff] %vm837_vm6, %v806_v7  ;;  %1547 = vmatprep.mubr.f32.mxu0 %v1331_v16 }
 0x226   : > { %1548 = vmatmul.mubr.f32.gmra.mrb[14].mxu0 %v1330_v17 }
 0x228   : > { %v1230_v19 = vpop.permute.xlu0 %1229  ;;  %v906_v20 = vpop.permute.xlu1 %905 }
 0x229   : > { %1269 = vst.msk [vmem:[#allocation3 + $0xc8] sm:$0xff] %vm937_vm7, %v1230_v19  ;;  %946 = vst.msk [vmem:[#allocation3 + $0xc0] sm:$0xff] %vm937_vm7, %v906_v20 }
 0x22c   : > { %v1037_v21 = vpop.permute.xlu0 %1036  ;;  %v711_v22 = vpop.permute.xlu1 %710 }
 0x22d   : > { %1075 = vst.msk [vmem:[#allocation3 + $0xe0] sm:$0xff] %vm740_vm5, %v1037_v21  ;;  %750 = vst.msk [vmem:[#allocation3 + $0xd8] sm:$0xff] %vm740_vm5, %v711_v22 }
 0x230   : > { %v1136_v24 = vpop.permute.xlu0 %1135  ;;  %v808_v25 = vpop.permute.xlu1 %807  ;;  %v1334_v0 = vld [vmem:[#allocation3 + $0xc8] sm:$0xff]  ;;  %v1333_v26 = vld [vmem:[#allocation3 + $0xc0] sm:$0xff] }
 0x231   : > { %1174 = vst.msk [vmem:[#allocation3 + $0xe0] sm:$0xff] %vm837_vm6, %v1136_v24  ;;  %847 = vst.msk [vmem:[#allocation3 + $0xd8] sm:$0xff] %vm837_vm6, %v808_v25  ;;  %1552 = vmatprep.mubr.f32.mxu0 %v1334_v0 }
 0x232   : > { %1553 = vmatmul.mubr.f32.gmra.mrb[16].mxu0 %v1333_v26 }
 0x234   : > { %v1232_v30 = vpop.permute.xlu0 %1231  ;;  %v908_v32 = vpop.permute.xlu1 %907 }
 0x235   : > { %1270 = vst.msk [vmem:[#allocation3 + $0xe0] sm:$0xff] %vm937_vm7, %v1232_v30  ;;  %947 = vst.msk [vmem:[#allocation3 + $0xd8] sm:$0xff] %vm937_vm7, %v908_v32 }
 0x238   : > { %v1039_v37 = vpop.permute.xlu0 %1038  ;;  %v713_v28 = vpop.permute.xlu1 %712 }
 0x239   : > { %1076 = vst.msk [vmem:[#allocation3 + $0xf8] sm:$0xff] %vm740_vm5, %v1039_v37  ;;  %751 = vst.msk [vmem:[#allocation3 + $0xf0] sm:$0xff] %vm740_vm5, %v713_v28  ;;  %v3858_v37 = vld [vmem:[%s4039_s4] ss:$0 sm:$0xff] }
 0x23c   : > { %v1138_v41 = vpop.permute.xlu0 %1137  ;;  %v810_v3 = vpop.permute.xlu1 %809  ;;  %v1337_v60 = vld [vmem:[#allocation3 + $0xe0] sm:$0xff]  ;;  %v1336_v39 = vld [vmem:[#allocation3 + $0xd8] sm:$0xff] }
 0x23d   : > { %1175 = vst.msk [vmem:[#allocation3 + $0xf8] sm:$0xff] %vm837_vm6, %v1138_v41  ;;  %848 = vst.msk [vmem:[#allocation3 + $0xf0] sm:$0xff] %vm837_vm6, %v810_v3  ;;  %1557 = vmatprep.mubr.f32.mxu0 %v1337_v60 }
 0x23e   : > { %1558 = vmatmul.mubr.f32.gmra.mrb[18].mxu0 %v1336_v39 }
 0x240   : > { %v1234_v40 = vpop.permute.xlu0 %1233  ;;  %v910_v13 = vpop.permute.xlu1 %909 }
 0x241   : > { %1271 = vst.msk [vmem:[#allocation3 + $0xf8] sm:$0xff] %vm937_vm7, %v1234_v40  ;;  %948 = vst.msk [vmem:[#allocation3 + $0xf0] sm:$0xff] %vm937_vm7, %v910_v13 }
 0x242   : > { %v3803_v49 = vpop.f32.mrb[0].mxu1 }
 0x243   : > { %v3805_v53 = vpop.f32.mrb[1].mxu1 }
 0x244   : > { %v1041_v57 = vpop.permute.xlu0 %1040 }
 0x245   : > { %1077 = vst.msk [vmem:[#allocation3 + $0x110] sm:$0xff] %vm740_vm5, %v1041_v57  ;;  %v715_v62 = vpop.permute.xlu1 %714 }
 0x246   : > { %752 = vst.msk [vmem:[#allocation3 + $0x108] sm:$0xff] %vm740_vm5, %v715_v62  ;;  %v3809_v6 = vpop.f32.mrb[2].mxu1 }
 0x247   : > { %v3811_v56 = vpop.f32.mrb[3].mxu1 }
 0x248   : > { %v1140_v2 = vpop.permute.xlu0 %1139  ;;  %v1340_v38 = vld [vmem:[#allocation3 + $0xf8] sm:$0xff]  ;;  %v1339_v5 = vld [vmem:[#allocation3 + $0xf0] sm:$0xff] }
 0x249   : > { %1176 = vst.msk [vmem:[#allocation3 + $0x110] sm:$0xff] %vm837_vm6, %v1140_v2  ;;  %v812_v43 = vpop.permute.xlu1 %811  ;;  %1562 = vmatprep.mubr.f32.mxu0 %v1340_v38 }
 0x24a   : > { %849 = vst.msk [vmem:[#allocation3 + $0x108] sm:$0xff] %vm837_vm6, %v812_v43  ;;  %1563 = vmatmul.mubr.f32.gmra.mrb[20].mxu0 %v1339_v5 }
 0x24c   : > { %v1236_v31 = vpop.permute.xlu0 %1235 }
 0x24d   : > { %1272 = vst.msk [vmem:[#allocation3 + $0x110] sm:$0xff] %vm937_vm7, %v1236_v31  ;;  %v912_v61 = vpop.permute.xlu1 %911 }
 0x24e   : > { %949 = vst.msk [vmem:[#allocation3 + $0x108] sm:$0xff] %vm937_vm7, %v912_v61  ;;  %v3821_v10 = vpop.f32.mrb[4].mxu1 }
 0x24f   : > { %v3823_v55 = vpop.f32.mrb[5].mxu1 }
 0x250   : > { %v1043_v50 = vpop.permute.xlu0 %1042 }
 0x251   : > { %1078 = vst.msk [vmem:[#allocation3 + $0x128] sm:$0xff] %vm740_vm5, %v1043_v50  ;;  %v717_v63 = vpop.permute.xlu1 %716 }
 0x252   : > { %753 = vst.msk [vmem:[#allocation3 + $0x120] sm:$0xff] %vm740_vm5, %v717_v63 }
 0x254   : > { %v1142_v1 = vpop.permute.xlu0 %1141  ;;  %v1343_v8 = vld [vmem:[#allocation3 + $0x110] sm:$0xff] }
 0x255   : > { %1177 = vst.msk [vmem:[#allocation3 + $0x128] sm:$0xff] %vm837_vm6, %v1142_v1  ;;  %v814_v12 = vpop.permute.xlu1 %813  ;;  %1567 = vmatprep.mubr.f32.mxu0 %v1343_v8  ;;  %v1342_v23 = vld [vmem:[#allocation3 + $0x108] sm:$0xff] }
 0x256   : > { %850 = vst.msk [vmem:[#allocation3 + $0x120] sm:$0xff] %vm837_vm6, %v814_v12  ;;  %1568 = vmatmul.mubr.f32.gmra.mrb[22].mxu0 %v1342_v23 }
 0x258   : > { %v1238_v34 = vpop.permute.xlu0 %1237 }
 0x259   : > { %1273 = vst.msk [vmem:[#allocation3 + $0x128] sm:$0xff] %vm937_vm7, %v1238_v34  ;;  %v914_v42 = vpop.permute.xlu1 %913 }
 0x25a   : > { %950 = vst.msk [vmem:[#allocation3 + $0x120] sm:$0xff] %vm937_vm7, %v914_v42 }
 0x25c   : > { %v1045_v54 = vpop.permute.xlu0 %1044 }
 0x25d   : > { %1079 = vst.msk [vmem:[#allocation3 + $0x140] sm:$0xff] %vm740_vm5, %v1045_v54  ;;  %v719_v44 = vpop.permute.xlu1 %718 }
 0x25e   : > { %754 = vst.msk [vmem:[#allocation3 + $0x138] sm:$0xff] %vm740_vm5, %v719_v44 }
 0x260   : > { %v1144_v18 = vpop.permute.xlu0 %1143  ;;  %v1346_v4 = vld [vmem:[#allocation3 + $0x128] sm:$0xff] }
 0x261   : > { %1178 = vst.msk [vmem:[#allocation3 + $0x140] sm:$0xff] %vm837_vm6, %v1144_v18  ;;  %v816_v45 = vpop.permute.xlu1 %815  ;;  %1572 = vmatprep.mubr.f32.mxu0 %v1346_v4  ;;  %v1345_v46 = vld [vmem:[#allocation3 + $0x120] sm:$0xff] }
 0x262   : > { %851 = vst.msk [vmem:[#allocation3 + $0x138] sm:$0xff] %vm837_vm6, %v816_v45  ;;  %1573 = vmatmul.mubr.f32.gmra.mrb[24].mxu0 %v1345_v46 }
 0x263   : > { %v3837_v16 = vpop.f32.mrb[6].mxu1 }
 0x264   : > { %v1240_v47 = vpop.permute.xlu0 %1239  ;;  %v3839_v17 = vpop.f32.mrb[7].mxu1 }
 0x265   : > { %1274 = vst.msk [vmem:[#allocation3 + $0x140] sm:$0xff] %vm937_vm7, %v1240_v47  ;;  %v916_v48 = vpop.permute.xlu1 %915 }
 0x266   : > { %951 = vst.msk [vmem:[#allocation3 + $0x138] sm:$0xff] %vm937_vm7, %v916_v48 }
 0x268   : > { %v1047_v51 = vpop.permute.xlu0 %1046 }
 0x269   : > { %1080 = vst.msk [vmem:[#allocation3 + $0x158] sm:$0xff] %vm740_vm5, %v1047_v51  ;;  %v721_v52 = vpop.permute.xlu1 %720 }
 0x26a   : > { %755 = vst.msk [vmem:[#allocation3 + $0x150] sm:$0xff] %vm740_vm5, %v721_v52  ;;  %v3847_v29 = vpop.f32.mrb[8].mxu1 }
 0x26b   : > { %v3849_v30 = vpop.f32.mrb[9].mxu1 }
 0x26c   : > { %v1146_v58 = vpop.permute.xlu0 %1145  ;;  %v1349_v59 = vld [vmem:[#allocation3 + $0x140] sm:$0xff] }
 0x26d   : > { %1179 = vst.msk [vmem:[#allocation3 + $0x158] sm:$0xff] %vm837_vm6, %v1146_v58  ;;  %v818_v9 = vpop.permute.xlu1 %817  ;;  %1577 = vmatprep.mubr.f32.mxu0 %v1349_v59  ;;  %v1348_v14 = vld [vmem:[#allocation3 + $0x138] sm:$0xff] }
 0x26e   : > { %852 = vst.msk [vmem:[#allocation3 + $0x150] sm:$0xff] %vm837_vm6, %v818_v9  ;;  %1578 = vmatmul.mubr.f32.gmra.mrb[26].mxu0 %v1348_v14 }
 0x270   : > { %v1242_v15 = vpop.permute.xlu0 %1241 }
 0x271   : > { %1275 = vst.msk [vmem:[#allocation3 + $0x158] sm:$0xff] %vm937_vm7, %v1242_v15  ;;  %v918_v7 = vpop.permute.xlu1 %917 }
 0x272   : > { %952 = vst.msk [vmem:[#allocation3 + $0x150] sm:$0xff] %vm937_vm7, %v918_v7 }
 0x274   : > { %v1049_v19 = vpop.permute.xlu0 %1048 }
 0x275   : > { %1081 = vst.msk [vmem:[#allocation3 + $0x170] sm:$0xff] %vm740_vm5, %v1049_v19  ;;  %v723_v20 = vpop.permute.xlu1 %722 }
 0x276   : > { %756 = vst.msk [vmem:[#allocation3 + $0x168] sm:$0xff] %vm740_vm5, %v723_v20 }
 0x278   : > { %v1148_v21 = vpop.permute.xlu0 %1147  ;;  %v1352_v22 = vld [vmem:[#allocation3 + $0x158] sm:$0xff] }
 0x279   : > { %1180 = vst.msk [vmem:[#allocation3 + $0x170] sm:$0xff] %vm837_vm6, %v1148_v21  ;;  %v820_v24 = vpop.permute.xlu1 %819  ;;  %1582 = vmatprep.mubr.f32.mxu0 %v1352_v22  ;;  %v1351_v25 = vld [vmem:[#allocation3 + $0x150] sm:$0xff] }
 0x27a   : > { %853 = vst.msk [vmem:[#allocation3 + $0x168] sm:$0xff] %vm837_vm6, %v820_v24  ;;  %1583 = vmatmul.mubr.f32.gmra.mrb[28].mxu0 %v1351_v25 }
 0x27c   : > { %v1244_v0 = vpop.permute.xlu0 %1243 }
 0x27d   : > { %1276 = vst.msk [vmem:[#allocation3 + $0x170] sm:$0xff] %vm937_vm7, %v1244_v0  ;;  %v920_v26 = vpop.permute.xlu1 %919 }
 0x27e   : > { %953 = vst.msk [vmem:[#allocation3 + $0x168] sm:$0xff] %vm937_vm7, %v920_v26 }
 0x284   : > { %v1355_v11 = vld [vmem:[#allocation3 + $0x170] sm:$0xff] }
 0x285   : > { %1587 = vmatprep.mubr.f32.mxu0 %v1355_v11  ;;  %v1354_v27 = vld [vmem:[#allocation3 + $0x168] sm:$0xff] }
 0x286   : > { %1588 = vmatmul.mubr.f32.gmra.mrb[30].mxu0 %v1354_v27 }
 0x29a   : > { %v3851_v32 = vpop.f32.mrb[10].mxu1 }
 0x29b   : > { %v3853_v33 = vpop.f32.mrb[11].mxu1 }
 0x2a5   : > { %v2421_v35 = vpop.f32.mrb[0].mxu0 }
 0x2a6   : > { %v2422_v36 = vpop.f32.mrb[1].mxu0 }
 0x2a7   : > { %v2423_v28 = vadd.f32 %v2422_v36, %v2421_v35 }
 0x2a9   : > { %v1515_v41 = vadd.f32 %v2423_v28, %v3858_v37 }
 0x2ab   : > { %v1660_v3 = vadd.f32 %v3805_v53, %v1515_v41 }
 0x2ad   : > { %v1738_v60 = vmax.f32 %v1660_v3, 0.0 }
 0x2af   : > { %2605 = vmatprep.mubr.msk.f32.mxu1 %vm643_vm4, %v1738_v60 }
 0x2b1   : > { %v2424_v39 = vpop.f32.mrb[2].mxu0 }
 0x2b2   : > { %v2425_v40 = vpop.f32.mrb[3].mxu0 }
 0x2b3   : > { %v2426_v13 = vadd.f32 %v2425_v40, %v2424_v39 }
 0x2b4   : > { %v3865_v38 = vpop.f32.mrb[12].mxu1 }
 0x2b5   : > { %v1520_v57 = vadd.f32 %v2426_v13, %v3858_v37  ;;  %v3868_v5 = vpop.f32.mrb[13].mxu1 }
 0x2b7   : > { %v1665_v62 = vadd.f32 %v3803_v49, %v1520_v57 }
 0x2b9   : > { %v1739_v2 = vmax.f32 %v1665_v62, 0.0 }
 0x2bb   : > { %2606 = vmatmul.mubr.msk.f32.vlgmr.msra.gmra.mrb[16].mxu1 %vm643_vm4, %v1739_v2 }
 0x2bd   : > { %v2427_v43 = vpop.f32.mrb[4].mxu0 }
 0x2be   : > { %v2428_v31 = vpop.f32.mrb[5].mxu0 }
 0x2bf   : > { %v2429_v53 = vadd.f32 %v2428_v31, %v2427_v43 }
 0x2c1   : > { %v1525_v61 = vadd.f32 %v2429_v53, %v3858_v37 }
 0x2c3   : > { %v1670_v50 = vadd.f32 %v3811_v56, %v1525_v61 }
 0x2c5   : > { %v1740_v63 = vmax.f32 %v1670_v50, 0.0 }
 0x2c7   : > { %2608 = vmatprep.mubr.msk.f32.mxu1 %vm643_vm4, %v1740_v63 }
 0x2c9   : > { %v2430_v1 = vpop.f32.mrb[6].mxu0 }
 0x2ca   : > { %v2431_v8 = vpop.f32.mrb[7].mxu0 }
 0x2cb   : > { %v2432_v49 = vadd.f32 %v2431_v8, %v2430_v1 }
 0x2cc   : > { %v3875_v42 = vpop.f32.mrb[14].mxu1 }
 0x2cd   : > { %v1530_v12 = vadd.f32 %v2432_v49, %v3858_v37  ;;  %v3878_v54 = vpop.f32.mrb[15].mxu1 }
 0x2cf   : > { %v1675_v23 = vadd.f32 %v3809_v6, %v1530_v12 }
 0x2d1   : > { %v1741_v34 = vmax.f32 %v1675_v23, 0.0 }
 0x2d3   : > { %2609 = vmatmul.mubr.msk.f32.gmra.mrb[18].mxu1 %vm643_vm4, %v1741_v34 }
 0x2d5   : > { %v2433_v44 = vpop.f32.mrb[8].mxu0 }
 0x2d6   : > { %v2434_v18 = vpop.f32.mrb[9].mxu0 }
 0x2d7   : > { %v2435_v56 = vadd.f32 %v2434_v18, %v2433_v44 }
 0x2d9   : > { %v1535_v4 = vadd.f32 %v2435_v56, %v3858_v37 }
 0x2db   : > { %v1680_v45 = vadd.f32 %v3823_v55, %v1535_v4 }
 0x2dd   : > { %v1742_v46 = vmax.f32 %v1680_v45, 0.0 }
 0x2df   : > { %2611 = vmatprep.mubr.msk.f32.mxu1 %vm643_vm4, %v1742_v46 }
 0x2e1   : > { %v2436_v47 = vpop.f32.mrb[10].mxu0 }
 0x2e2   : > { %v2437_v48 = vpop.f32.mrb[11].mxu0 }
 0x2e3   : > { %v2438_v6 = vadd.f32 %v2437_v48, %v2436_v47 }
 0x2e5   : > { %v1540_v51 = vadd.f32 %v2438_v6, %v3858_v37 }
 0x2e7   : > { %v1685_v52 = vadd.f32 %v3821_v10, %v1540_v51 }
 0x2e9   : > { %v1743_v58 = vmax.f32 %v1685_v52, 0.0 }
 0x2eb   : > { %2612 = vmatmul.mubr.msk.f32.gmra.mrb[20].mxu1 %vm643_vm4, %v1743_v58  ;;  %v3919_v58 = vld [vmem:[%s4041_s6] ss:$0 sm:$0xff] }
 0x2ed   : > { %v2439_v59 = vpop.f32.mrb[12].mxu0 }
 0x2ee   : > { %v2440_v9 = vpop.f32.mrb[13].mxu0 }
 0x2ef   : > { %v2441_v14 = vadd.f32 %v2440_v9, %v2439_v59 }
 0x2f1   : > { %v1545_v15 = vadd.f32 %v2441_v14, %v3858_v37  ;;  %v1758_v14 = vld [vmem:[#allocation4] sm:$0xff] }
 0x2f3   : > { %v1690_v55 = vadd.f32 %v3839_v17, %v1545_v15 }
 0x2f5   : > { %v1744_v7 = vmax.f32 %v1690_v55, 0.0 }
 0x2f7   : > { %2614 = vmatprep.mubr.msk.f32.mxu1 %vm643_vm4, %v1744_v7 }
 0x2f9   : > { %v2442_v19 = vpop.f32.mrb[14].mxu0 }
 0x2fa   : > { %v2443_v20 = vpop.f32.mrb[15].mxu0 }
 0x2fb   : > { %v2444_v21 = vadd.f32 %v2443_v20, %v2442_v19  ;;  %v1761_v20 = vld [vmem:[#allocation4 + $0x18] sm:$0xff] }
 0x2fd   : > { %v1550_v22 = vadd.f32 %v2444_v21, %v3858_v37 }
 0x2ff   : > { %v1695_v10 = vadd.f32 %v3837_v16, %v1550_v22 }
 0x301   : > { %v1745_v24 = vmax.f32 %v1695_v10, 0.0  ;;  %v1760_v10 = vld [vmem:[#allocation4 + $0x10] sm:$0xff] }
 0x303   : > { %2615 = vmatmul.mubr.msk.f32.gmra.mrb[22].mxu1 %vm643_vm4, %v1745_v24 }
 0x305   : > { %v2445_v25 = vpop.f32.mrb[16].mxu0 }
 0x306   : > { %v2446_v0 = vpop.f32.mrb[17].mxu0 }
 0x307   : > { %v2447_v26 = vadd.f32 %v2446_v0, %v2445_v25 }
 0x309   : > { %v1555_v11 = vadd.f32 %v2447_v26, %v3858_v37 }
 0x30b   : > { %v1700_v17 = vadd.f32 %v3849_v30, %v1555_v11 }
 0x30d   : > { %v1746_v27 = vmax.f32 %v1700_v17, 0.0 }
 0x30f   : > { %2617 = vmatprep.mubr.msk.f32.mxu1 %vm643_vm4, %v1746_v27  ;;  %v1763_v27 = vld [vmem:[#allocation4 + $0x28] sm:$0xff] }
 0x311   : > { %v2448_v35 = vpop.f32.mrb[18].mxu0 }
 0x312   : > { %v2449_v36 = vpop.f32.mrb[19].mxu0 }
 0x313   : > { %v2450_v28 = vadd.f32 %v2449_v36, %v2448_v35 }
 0x315   : > { %v1560_v41 = vadd.f32 %v2450_v28, %v3858_v37  ;;  %v1762_v28 = vld [vmem:[#allocation4 + $0x20] sm:$0xff] }
 0x317   : > { %v1705_v16 = vadd.f32 %v3847_v29, %v1560_v41 }
 0x319   : > { %v1747_v3 = vmax.f32 %v1705_v16, 0.0 }
 0x31b   : > { %2618 = vmatmul.mubr.msk.f32.gmra.mrb[24].mxu1 %vm643_vm4, %v1747_v3 }
 0x31d   : > { %v2451_v60 = vpop.f32.mrb[20].mxu0 }
 0x31e   : > { %v2452_v39 = vpop.f32.mrb[21].mxu0 }
 0x31f   : > { %v2453_v40 = vadd.f32 %v2452_v39, %v2451_v60 }
 0x321   : > { %v1565_v13 = vadd.f32 %v2453_v40, %v3858_v37 }
 0x323   : > { %v1710_v30 = vadd.f32 %v3853_v33, %v1565_v13  ;;  %v1765_v13 = vld [vmem:[#allocation4 + $0x38] sm:$0xff] }
 0x325   : > { %v1748_v57 = vmax.f32 %v1710_v30, 0.0 }
 0x327   : > { %2620 = vmatprep.mubr.msk.f32.mxu1 %vm643_vm4, %v1748_v57 }
 0x329   : > { %v2454_v62 = vpop.f32.mrb[22].mxu0 }
 0x32a   : > { %v2455_v2 = vpop.f32.mrb[23].mxu0 }
 0x32b   : > { %v2456_v43 = vadd.f32 %v2455_v2, %v2454_v62  ;;  %v1764_v62 = vld [vmem:[#allocation4 + $0x30] sm:$0xff] }
 0x32d   : > { %v1570_v31 = vadd.f32 %v2456_v43, %v3858_v37 }
 0x32f   : > { %v1715_v29 = vadd.f32 %v3851_v32, %v1570_v31 }
 0x331   : > { %v1749_v53 = vmax.f32 %v1715_v29, 0.0 }
 0x333   : > { %2621 = vmatmul.mubr.msk.f32.gmra.mrb[26].mxu1 %vm643_vm4, %v1749_v53 }
 0x335   : > { %v2457_v61 = vpop.f32.mrb[24].mxu0 }
 0x336   : > { %v2458_v50 = vpop.f32.mrb[25].mxu0 }
 0x337   : > { %v2459_v63 = vadd.f32 %v2458_v50, %v2457_v61  ;;  %v1767_v50 = vld [vmem:[#allocation4 + $0x48] sm:$0xff] }
 0x339   : > { %v1575_v1 = vadd.f32 %v2459_v63, %v3858_v37 }
 0x33b   : > { %v1720_v33 = vadd.f32 %v3868_v5, %v1575_v1 }
 0x33d   : > { %v1750_v8 = vmax.f32 %v1720_v33, 0.0  ;;  %v1766_v33 = vld [vmem:[#allocation4 + $0x40] sm:$0xff] }
 0x33f   : > { %2623 = vmatprep.mubr.msk.f32.mxu1 %vm643_vm4, %v1750_v8 }
 0x341   : > { %v2460_v49 = vpop.f32.mrb[26].mxu0 }
 0x342   : > { %v2461_v12 = vpop.f32.mrb[27].mxu0 }
 0x343   : > { %v2462_v23 = vadd.f32 %v2461_v12, %v2460_v49 }
 0x345   : > { %v1580_v34 = vadd.f32 %v2462_v23, %v3858_v37 }
 0x347   : > { %v1725_v32 = vadd.f32 %v3865_v38, %v1580_v34 }
 0x349   : > { %v1751_v44 = vmax.f32 %v1725_v32, 0.0 }
 0x34b   : > { %2624 = vmatmul.mubr.msk.f32.gmra.mrb[28].mxu1 %vm643_vm4, %v1751_v44  ;;  %v1769_v44 = vld [vmem:[#allocation4 + $0x58] sm:$0xff] }
 0x34d   : > { %v2463_v18 = vpop.f32.mrb[28].mxu0 }
 0x34e   : > { %v2464_v56 = vpop.f32.mrb[29].mxu0 }
 0x34f   : > { %v2465_v4 = vadd.f32 %v2464_v56, %v2463_v18 }
 0x351   : > { %v1585_v45 = vadd.f32 %v2465_v4, %v3858_v37  ;;  %v1768_v4 = vld [vmem:[#allocation4 + $0x50] sm:$0xff] }
 0x353   : > { %v1730_v5 = vadd.f32 %v3878_v54, %v1585_v45  ;;  %v1759_v54 = vld [vmem:[#allocation4 + $0x8] sm:$0xff] }
 0x355   : > { %v1752_v46 = vmax.f32 %v1730_v5, 0.0 }
 0x357   : > { %2626 = vmatprep.mubr.msk.f32.mxu1 %vm643_vm4, %v1752_v46 }
 0x359   : > { %v2466_v47 = vpop.f32.mrb[30].mxu0 }
 0x35a   : > { %v2467_v48 = vpop.f32.mrb[31].mxu0 }
 0x35b   : > { %v2468_v6 = vadd.f32 %v2467_v48, %v2466_v47 }
 0x35d   : > { %v1590_v51 = vadd.f32 %v2468_v6, %v3858_v37 }
 0x35f   : > { %v1735_v38 = vadd.f32 %v3875_v42, %v1590_v51  ;;  %v1771_v51 = vld [vmem:[#allocation4 + $0x68] sm:$0xff] }
 0x361   : > { %v1753_v52 = vmax.f32 %v1735_v38, 0.0 }
 0x363   : > { %2627 = vmatmul.mubr.msk.f32.gmra.mrb[30].mxu1 %vm643_vm4, %v1753_v52 }
 0x38e   : > { %v2607_v59 = vpop.f32.mrb[16].mxu1 }
 0x38f   : > { %v1901_v9 = vadd.f32 %v2607_v59, %v3919_v58  ;;  %v1895_v15 = vpop.f32.mrb[17].mxu1 }
 0x390   : > { %v1896_v55 = vadd.f32 %v3919_v58, %v1895_v15 }
 0x391   : > { %v1975_v37 = vadd.f32 %v1901_v9, %v1759_v54  ;;  %v1770_v54 = vld [vmem:[#allocation4 + $0x60] sm:$0xff] }
 0x392   : > { %v1974_v7 = vadd.f32 %v1896_v55, %v1758_v14 }
 0x393   : > { %v1991_v42 = vmax.f32 %v1975_v37, 0.0 }
 0x394   : > { %v1990_v19 = vmax.f32 %v1974_v7, 0.0  ;;  %v1773_v7 = vld [vmem:[#allocation4 + $0x78] sm:$0xff] }
 0x395   : > { %2007 = vst [vmem:[%s3030_s30 + $0x8] sm:$0xff] %v1991_v42 }
 0x396   : > { %2006 = vst [vmem:[%s3030_s30] sm:$0xff] %v1990_v19 }
 0x3a6   : > { %v2610_v21 = vpop.f32.mrb[18].mxu1 }
 0x3a7   : > { %v1911_v22 = vadd.f32 %v2610_v21, %v3919_v58  ;;  %v1905_v24 = vpop.f32.mrb[19].mxu1 }
 0x3a8   : > { %v1906_v25 = vadd.f32 %v3919_v58, %v1905_v24 }
 0x3a9   : > { %v1977_v0 = vadd.f32 %v1911_v22, %v1761_v20  ;;  %v1772_v20 = vld [vmem:[#allocation4 + $0x70] sm:$0xff] }
 0x3aa   : > { %v1976_v26 = vadd.f32 %v1906_v25, %v1760_v10 }
 0x3ab   : > { %v1993_v11 = vmax.f32 %v1977_v0, 0.0 }
 0x3ac   : > { %v1992_v17 = vmax.f32 %v1976_v26, 0.0 }
 0x3ad   : > { %2009 = vst [vmem:[%s3030_s30 + $0x18] sm:$0xff] %v1993_v11 }
 0x3ae   : > { %2008 = vst [vmem:[%s3030_s30 + $0x10] sm:$0xff] %v1992_v17 }
 0x3be   : > { %v2613_v35 = vpop.f32.mrb[20].mxu1 }
 0x3bf   : > { %v1921_v36 = vadd.f32 %v2613_v35, %v3919_v58  ;;  %v1915_v41 = vpop.f32.mrb[21].mxu1 }
 0x3c0   : > { %v1916_v16 = vadd.f32 %v3919_v58, %v1915_v41 }
 0x3c1   : > { %v1979_v3 = vadd.f32 %v1921_v36, %v1763_v27 }
 0x3c2   : > { %v1978_v60 = vadd.f32 %v1916_v16, %v1762_v28 }
 0x3c3   : > { %v1995_v39 = vmax.f32 %v1979_v3, 0.0 }
 0x3c4   : > { %v1994_v40 = vmax.f32 %v1978_v60, 0.0 }
 0x3c5   : > { %2011 = vst [vmem:[%s3030_s30 + $0x28] sm:$0xff] %v1995_v39 }
 0x3c6   : > { %2010 = vst [vmem:[%s3030_s30 + $0x20] sm:$0xff] %v1994_v40 }
 0x3d6   : > { %v2616_v30 = vpop.f32.mrb[22].mxu1 }
 0x3d7   : > { %v1931_v57 = vadd.f32 %v2616_v30, %v3919_v58  ;;  %v1925_v2 = vpop.f32.mrb[23].mxu1 }
 0x3d8   : > { %v1926_v43 = vadd.f32 %v3919_v58, %v1925_v2 }
 0x3d9   : > { %v1981_v31 = vadd.f32 %v1931_v57, %v1765_v13 }
 0x3da   : > { %v1980_v29 = vadd.f32 %v1926_v43, %v1764_v62 }
 0x3db   : > { %v1997_v53 = vmax.f32 %v1981_v31, 0.0 }
 0x3dc   : > { %v1996_v61 = vmax.f32 %v1980_v29, 0.0 }
 0x3dd   : > { %2013 = vst [vmem:[%s3030_s30 + $0x38] sm:$0xff] %v1997_v53 }
 0x3de   : > { %2012 = vst [vmem:[%s3030_s30 + $0x30] sm:$0xff] %v1996_v61 }
 0x3ee   : > { %v2619_v63 = vpop.f32.mrb[24].mxu1 }
 0x3ef   : > { %v1941_v1 = vadd.f32 %v2619_v63, %v3919_v58  ;;  %v1935_v8 = vpop.f32.mrb[25].mxu1 }
 0x3f0   : > { %v1936_v49 = vadd.f32 %v3919_v58, %v1935_v8 }
 0x3f1   : > { %v1983_v12 = vadd.f32 %v1941_v1, %v1767_v50 }
 0x3f2   : > { %v1982_v23 = vadd.f32 %v1936_v49, %v1766_v33 }
 0x3f3   : > { %v1999_v34 = vmax.f32 %v1983_v12, 0.0 }
 0x3f4   : > { %v1998_v32 = vmax.f32 %v1982_v23, 0.0 }
 0x3f5   : > { %2015 = vst [vmem:[%s3030_s30 + $0x48] sm:$0xff] %v1999_v34 }
 0x3f6   : > { %2014 = vst [vmem:[%s3030_s30 + $0x40] sm:$0xff] %v1998_v32 }
 0x406   : > { %v2622_v18 = vpop.f32.mrb[26].mxu1 }
 0x407   : > { %v1951_v56 = vadd.f32 %v2622_v18, %v3919_v58  ;;  %v1945_v45 = vpop.f32.mrb[27].mxu1 }
 0x408   : > { %v1946_v5 = vadd.f32 %v3919_v58, %v1945_v45 }
 0x409   : > { %v1985_v46 = vadd.f32 %v1951_v56, %v1769_v44 }
 0x40a   : > { %v1984_v47 = vadd.f32 %v1946_v5, %v1768_v4 }
 0x40b   : > { %v2001_v48 = vmax.f32 %v1985_v46, 0.0 }
 0x40c   : > { %v2000_v6 = vmax.f32 %v1984_v47, 0.0 }
 0x40d   : > { %2017 = vst [vmem:[%s3030_s30 + $0x58] sm:$0xff] %v2001_v48 }
 0x40e   : > { %2016 = vst [vmem:[%s3030_s30 + $0x50] sm:$0xff] %v2000_v6 }
 0x41e   : > { %v2625_v38 = vpop.f32.mrb[28].mxu1 }
 0x41f   : > { %v1961_v52 = vadd.f32 %v2625_v38, %v3919_v58  ;;  %v1955_v59 = vpop.f32.mrb[29].mxu1 }
 0x420   : > { %v1956_v9 = vadd.f32 %v3919_v58, %v1955_v59 }
 0x421   : > { %v1987_v14 = vadd.f32 %v1961_v52, %v1771_v51 }
 0x422   : > { %v1986_v15 = vadd.f32 %v1956_v9, %v1770_v54 }
 0x423   : > { %v2003_v55 = vmax.f32 %v1987_v14, 0.0 }
 0x424   : > { %v2002_v37 = vmax.f32 %v1986_v15, 0.0 }
 0x425   : > { %2019 = vst [vmem:[%s3030_s30 + $0x68] sm:$0xff] %v2003_v55 }
 0x426   : > { %2018 = vst [vmem:[%s3030_s30 + $0x60] sm:$0xff] %v2002_v37 }
 0x436   : > { %v2628_v42 = vpop.f32.mrb[30].mxu1 }
 0x437   : > { %v1971_v19 = vadd.f32 %v2628_v42, %v3919_v58  ;;  %v1965_v21 = vpop.f32.mrb[31].mxu1 }
 0x438   : > { %v1966_v22 = vadd.f32 %v3919_v58, %v1965_v21 }
 0x439   : > { %v1989_v10 = vadd.f32 %v1971_v19, %v1773_v7 }
 0x43a   : > { %v1988_v24 = vadd.f32 %v1966_v22, %v1772_v20 }
 0x43b   : > { %v2005_v25 = vmax.f32 %v1989_v10, 0.0 }
 0x43c   : > { %v2004_v0 = vmax.f32 %v1988_v24, 0.0 }
 0x43d   : > { %2021 = vst [vmem:[%s3030_s30 + $0x78] sm:$0xff] %v2005_v25 }
 0x43e   : > { %2020 = vst [vmem:[%s3030_s30 + $0x70] sm:$0xff] %v2004_v0 }
 0x43f PF: > { %2024 = sbr.rel (%p2189_p4) target bundleno = 1096 (0x448), region = 64  ;;  %v2025_v58 = vld [vmem:[%s3028_s11] sm:$0xff] (!%p2189_p4)  ;;  %v2026_v26 = vld [vmem:[%s3028_s11 + $0x8] sm:$0xff] (!%p2189_p4)  ;;  %v2027_v11 = vld [vmem:[%s3028_s11 + $0x10] sm:$0xff] (!%p2189_p4) }
 0x440   : > { %2041 = vst [vmem:[#allocation4] sm:$0xff] (!%p2189_p4), %v2025_v58  ;;  %2042 = vst [vmem:[#allocation4 + $0x8] sm:$0xff] (!%p2189_p4), %v2026_v26  ;;  %v2028_v17 = vld [vmem:[%s3028_s11 + $0x18] sm:$0xff] (!%p2189_p4)  ;;  %v2029_v27 = vld [vmem:[%s3028_s11 + $0x20] sm:$0xff] (!%p2189_p4) }
 0x441   : > { %2043 = vst [vmem:[#allocation4 + $0x10] sm:$0xff] (!%p2189_p4), %v2027_v11  ;;  %v2030_v35 = vld [vmem:[%s3028_s11 + $0x28] sm:$0xff] (!%p2189_p4)  ;;  %2044 = vst [vmem:[#allocation4 + $0x18] sm:$0xff] (!%p2189_p4), %v2028_v17  ;;  %v2031_v36 = vld [vmem:[%s3028_s11 + $0x30] sm:$0xff] (!%p2189_p4) }
 0x442   : > { %2045 = vst [vmem:[#allocation4 + $0x20] sm:$0xff] (!%p2189_p4), %v2029_v27  ;;  %2046 = vst [vmem:[#allocation4 + $0x28] sm:$0xff] (!%p2189_p4), %v2030_v35  ;;  %v2032_v28 = vld [vmem:[%s3028_s11 + $0x38] sm:$0xff] (!%p2189_p4)  ;;  %v2033_v41 = vld [vmem:[%s3028_s11 + $0x40] sm:$0xff] (!%p2189_p4) }
 0x443   : > { %2047 = vst [vmem:[#allocation4 + $0x30] sm:$0xff] (!%p2189_p4), %v2031_v36  ;;  %2048 = vst [vmem:[#allocation4 + $0x38] sm:$0xff] (!%p2189_p4), %v2032_v28  ;;  %v2034_v16 = vld [vmem:[%s3028_s11 + $0x48] sm:$0xff] (!%p2189_p4)  ;;  %v2035_v3 = vld [vmem:[%s3028_s11 + $0x50] sm:$0xff] (!%p2189_p4) }
 0x444   : > { %2049 = vst [vmem:[#allocation4 + $0x40] sm:$0xff] (!%p2189_p4), %v2033_v41  ;;  %v2036_v60 = vld [vmem:[%s3028_s11 + $0x58] sm:$0xff] (!%p2189_p4)  ;;  %2050 = vst [vmem:[#allocation4 + $0x48] sm:$0xff] (!%p2189_p4), %v2034_v16  ;;  %v2037_v39 = vld [vmem:[%s3028_s11 + $0x60] sm:$0xff] (!%p2189_p4) }
 0x445   : > { %2051 = vst [vmem:[#allocation4 + $0x50] sm:$0xff] (!%p2189_p4), %v2035_v3  ;;  %2052 = vst [vmem:[#allocation4 + $0x58] sm:$0xff] (!%p2189_p4), %v2036_v60  ;;  %v2038_v40 = vld [vmem:[%s3028_s11 + $0x68] sm:$0xff] (!%p2189_p4)  ;;  %v2039_v13 = vld [vmem:[%s3028_s11 + $0x70] sm:$0xff] (!%p2189_p4) }
 0x446   : > { %2053 = vst [vmem:[#allocation4 + $0x60] sm:$0xff] %v2037_v39  ;;  %2054 = vst [vmem:[#allocation4 + $0x68] sm:$0xff] %v2038_v40  ;;  %v2040_v30 = vld [vmem:[%s3028_s11 + $0x78] sm:$0xff] }
 0x447   : > { %2055 = vst [vmem:[#allocation4 + $0x70] sm:$0xff] %v2039_v13  ;;  %2056 = vst [vmem:[#allocation4 + $0x78] sm:$0xff] %v2040_v30 }
 0x448 PF: > { %s2349_s14 = sadd.s32 4294967295, %s2880_s27  ;;  %s2352_s18 = sshll.u32 %s2884_s28, 5 }
 0x449   : > { %p2066_p5 = scmp.gt.s32.totalorder %s2349_s14, 0  ;;  %s2077_s23 = sshll.u32 %s3030_s30, 4  ;;  %s3974_s23 = int_to_ptr.vmem [resolvable:$true] %s2077_s23 }
 0x44a   : > { %s4057_s16 = sand.u32 1, %s2872_s25   ;;  %s2802_s27 = scalar_lea.vmem %s3974_s23, 2048 }
 0x44b   : > { %s4079_s14 = smov (!%p2066_p5, %s2349_s14), 0  ;;  %s3983_s10 = scalar_lea.sflag [#allocation6], %s4057_s16 }
 0x44c   : > { %s2356_s15 = sshll.u32 %s4079_s14, 4  ;;  %p2803_p6 = scmp.ne.s32.totalorder %s3974_s23, %s2802_s27 }
 0x44d   : > { %s2074_s9 = sadd.s32 %s2356_s15, %s2352_s18  ;;  %s2902_s28 = smov [#allocation5]  }
 0x44e   : > { %s2353_s11 = sshll.u32 %s2074_s9, 7  ;;  %p2804_p8 = pnand %p2803_p6, %p3003_p7 }
 0x44f   : > { %s3979_s22 = scalar_lea.hbm %s4042_s7, %s2353_s11  ;;  %s2806_s30 = sshll.u32 %s2902_s28, 4  ;;  %s2807_s30 = int_to_ptr.vmem [resolvable:$false] %s2806_s30 }
 0x450   : > { %p2805_p9 = pneg %p2804_p8  ;;  %s2808_s17 = scalar_lea.vmem %s2807_s30, 4096 }
 0x451   : > { %p2809_p10 = scmp.lt.s32.totalorder %s3974_s23, %s2807_s30  ;;  %p2810_p11 = scmp.lt.s32.totalorder %s2808_s17, %s2802_s27 }
 0x453   : > { %p2811_p13 = por %p2810_p11, %p2809_p10 }
 0x455   : > { %p2812_p0 = pnand %p2811_p13, %p2805_p9 }
 0x457   : > { %2815 = shalt.err (!%p2812_p0)
}
 0x458   : > { %s2816_s12 = scalar_lea.hbm %s3979_s22, 2048  ;;  %s2820_s15 = scalar_lea.hbm %s4042_s7, 8192 }
 0x459   : > { %p2817_p1 = scmp.ne.s32.totalorder %s3979_s22, %s2816_s12  ;;  %p2821_p4 = scmp.lt.u32.totalorder %s3979_s22, %s4042_s7 }
 0x45a   : > { %p2822_p5 = scmp.lt.u32.totalorder %s2820_s15, %s2816_s12  ;;  %p2824_p8 = scmp.lt.u32.totalorder %s2816_s12, %s3979_s22 }
 0x45b   : > { %p2818_p2 = pnand %p2817_p1, %p3003_p7 }
 0x45c   : > { %p2823_p6 = por %p2822_p5, %p2821_p4 }
 0x45d   : > { %p2819_p3 = pneg %p2818_p2 }
 0x45e   : > { %p2825_p9 = por %p2824_p8, %p2823_p6 }
 0x460   : > { %p2826_p10 = pnand %p2825_p9, %p2819_p3 }
 0x462   : > { %2829 = shalt.err (!%p2826_p10)
}
 0x463   : > { %s2903_s13 = smov 128   ;;  %s2904_s0 = smov 8  }
 0x464   : > { %2725 = dma.vmem_to_hbm [thread:$0]  (%p3003_p7), %s3974_s23, 2048, %s3979_s22, %s3983_s10, %s2903_s13, %s2903_s13, %s2904_s0  }
 0x465 PF: > { %p2731_p11 = scmp.ge.s32.totalorder %s2896_s8, 2  ;;  %s2092_s16 = sand.u32 1, %s2868_s24  }
 0x466   : > { %s2093_s27 = scalar_lea.sflag [#allocation6], %s2092_s16 }
 0x467   : > { %p2728_p13 = pnand %p2731_p11, %p3012_p12 }
 0x469   : > { %2863 = dma.done.wait (!%p2728_p13), %s2093_s27, 2048  }
 0x46a   : > { %2865 = vsyncadd (!%p2728_p13), %s2093_s27, 4294965248  ;;  %s20_s8 = sadd.s32 1, %s2896_s8   ;;  %s4058_s28 = sld [smem:[#allocation8_spill]] }
 0x46b   : > { %p17_p0 = scmp.ge.s32.totalorder %s20_s8, 8   ;;  %s4059_s19 = sld [smem:[#allocation9_spill]] }
 0x46c   : > { %s4060_s30 = sld [smem:[#allocation10_spill]]  ;;  %s4061_s24 = smov %s2872_s25 }
 0x46d   : > { %s4062_s25 = smov %s2876_s26  ;;  %s4063_s26 = smov %s3010_s20 }
 0x46e   : > { %s4064_s27 = smov %s2888_s29  ;;  %19 = sbr.rel (!%p17_p0) target bundleno = 7 (0x7), region = 104 }
 0x471   : > { %s4065_s29 = smov %s4059_s19 }
 0x475   :  { %2098 = vsyncpa [#allocation6], 1 }
 0x476   :  { %2100 = vsyncpa [#allocation6 + $0x1], 1 }

</bundles_post_ra>
